<compile_context>
chip_gen: v6e
topology: v6e:2x2x1
jax: 0.10.0
libtpu: 0.0.40
codegen_flags: <defaults>
</compile_context>

<pallas_src>
import jax
import jax.numpy as jnp
from jax import lax
from jax.experimental import pallas as pl
from jax.experimental.pallas import tpu as pltpu


# -----------------------------------------------------------------------------
# Fused kernel body
# -----------------------------------------------------------------------------
def _m_fused_kernel(x_ref, a_ref, w_ref, b_ref, o_ref):
    """x_ref: (B, CH, W) activations (B batches folded into this block).

    a_ref: (2, CH, 3*CH+8) f32  banded conv matrices [A_l|A_c|A_r|cb,0...] per block
    w_ref: (4, 256, 256) bf16   [blk0 lin0^T, blk0 lin1^T, blk1 lin0^T, blk1 lin1^T]
    b_ref: (4, 1, 256)  f32     matching biases
    """
    B, CH, W = x_ref.shape
    M = B * CH
    x = x_ref[...].reshape(M, W)

    # Hoisted once, shared by both blocks: lane-edge masks for the +-1
    # horizontal taps and the constant "ones" row that injects the conv bias.
    col = lax.broadcasted_iota(jnp.int32, (M, W), 1)
    left_edge = col == 0
    right_edge = col == W - 1
    row8 = lax.broadcasted_iota(jnp.int32, (8, W), 0)
    ones_pad = jnp.where(row8 == 0, 1.0, 0.0)                    # (8, W) f32

    for blk in range(2):
        a_cat = a_ref[blk]                                       # (CH, 3*CH+8)

        # Horizontal +-1 taps as lane rotations, zeroed at the padded edges.
        x_l = jnp.where(left_edge, 0.0, pltpu.roll(x, 1, axis=1))        # x[:, w-1]
        x_r = jnp.where(right_edge, 0.0, pltpu.roll(x, W - 1, axis=1))   # x[:, w+1]

        # Conv2d(16,16,3,pad=1) + bias as ONE matmul per batch:
        #   [A_l | A_c | A_r | cb] @ [x_l ; x ; x_r ; ones]
        ys = []
        for b in range(B):
            s = slice(b * CH, (b + 1) * CH)
            x_cat = jnp.concatenate([x_l[s], x[s], x_r[s], ones_pad], axis=0)
            ys.append(jnp.dot(a_cat, x_cat, preferred_element_type=jnp.float32))
        y = ys[0] if B == 1 else jnp.concatenate(ys, axis=0)     # (M, W) f32

        # lin0 over the last (W=256) dim: bf16 inputs, f32 accumulation.
        h = (jnp.dot(y.astype(jnp.bfloat16), w_ref[2 * blk],
                     preferred_element_type=jnp.float32) + b_ref[2 * blk])
        # NOTE: PyTorch `x.add(constant)` is out-of-place and its result is
        # discarded -> intentionally a no-op here.
        z = (jnp.dot(h.astype(jnp.bfloat16), w_ref[2 * blk + 1],
                     preferred_element_type=jnp.float32) + b_ref[2 * blk + 1])
        x = jnp.maximum(z, 0.0)                                   # ReLU

    o_ref[...] = x.reshape(B, CH, W).astype(o_ref.dtype)


# -----------------------------------------------------------------------------
# Wrapper
# -----------------------------------------------------------------------------
def _has_multiple_tensorcores():
    # v7x exposes 2 TensorCores per chip; older parts (v5e/v6e) have 1.
    try:
        kind = jax.devices()[0].device_kind.lower()
    except Exception:
        return False
    return ("v7" in kind) or ("7x" in kind)


def m_forward(prep, x, constant=None, *, fold_batch=None):
    del constant                              # no-op in the torch forward
    N, C, H, W = x.shape
    CH = C * H
    if fold_batch is None:
        fold_batch = not _has_multiple_tensorcores()
    bblk = N if fold_batch else 1             # batches per grid step
    x2 = x.reshape(N, CH, W)                  # contiguous view, no data movement

    weights = (prep["A"], prep["W"], prep["B"])

    def const_spec(a):
        nd = a.ndim
        return pl.BlockSpec(a.shape, lambda n, _nd=nd: (0,) * _nd,
                            pipeline_mode=pl.Buffered(1))

    out = pl.pallas_call(
        _m_fused_kernel,
        out_shape=jax.ShapeDtypeStruct((N, CH, W), x.dtype),
        grid=(N // bblk,),
        in_specs=[pl.BlockSpec((bblk, CH, W), lambda n: (n, 0, 0))]
                 + [const_spec(a) for a in weights],
        out_specs=pl.BlockSpec((bblk, CH, W), lambda n: (n, 0, 0)),
        compiler_params=pltpu.CompilerParams(
            dimension_semantics=("parallel",)),
    )(x2, *weights)
    return out.reshape(N, C, H, W)


m_forward_jit = jax.jit(m_forward, static_argnames=("fold_batch",))


# -----------------------------------------------------------------------------
# Parameters (PyTorch layout) + one-time kernel-friendly preparation
# -----------------------------------------------------------------------------
def init_block(key):
    kc, kcb, k0, k0b, k1, k1b = jax.random.split(key, 6)
    kconv = 1.0 / jnp.sqrt(16.0 * 9.0)
    klin = 1.0 / jnp.sqrt(256.0)
    return dict(
        conv_w=jax.random.uniform(kc, (16, 16, 3, 3), jnp.float32, -kconv, kconv),
        conv_b=jax.random.uniform(kcb, (16,), jnp.float32, -kconv, kconv),
        lin0_w=jax.random.uniform(k0, (256, 256), jnp.float32, -klin, klin),
        lin0_b=jax.random.uniform(k0b, (256,), jnp.float32, -klin, klin),
        lin1_w=jax.random.uniform(k1, (256, 256), jnp.float32, -klin, klin),
        lin1_b=jax.random.uniform(k1b, (256,), jnp.float32, -klin, klin),
    )


def _conv_band_matrices(conv_w, H):
    """(Co, Ci, 3, 3) -> (3, Co*H, Ci*H): one banded matrix per horizontal tap.

    A[dw, co*H + h, ci*H + h'] = conv_w[co, ci, h'-h+1, dw] if |h'-h| <= 1 else 0,
    folding the vertical taps AND the vertical zero padding into the band
    structure so the kernel never needs a padded tensor.
    """
    Co, Ci = conv_w.shape[:2]
    h_out = jnp.arange(H)[:, None]
    h_in = jnp.arange(H)[None, :]
    dh = h_in - h_out + 1                                    # (H, H)
    valid = (dh >= 0) & (dh <= 2)
    dh_c = jnp.clip(dh, 0, 2)
    w_dw = jnp.transpose(conv_w, (3, 0, 1, 2))               # (3, Co, Ci, 3)
    taps = w_dw[:, :, :, dh_c]                               # (3, Co, Ci, H, H)
    taps = jnp.where(valid[None, None, None], taps, 0.0)
    return jnp.transpose(taps, (0, 1, 3, 2, 4)).reshape(3, Co * H, Ci * H)


def prepare_weights(params0, params1, H):
    """One-time prep packing everything into 3 consolidated kernel inputs."""
    a_list, w_list, b_list = [], [], []
    for p in (params0, params1):
        A = _conv_band_matrices(p["conv_w"], H)                 # (3, CH, CH) f32
        CH = A.shape[1]
        cb = jnp.repeat(p["conv_b"], H)                         # (CH,)
        aug = jnp.zeros((CH, 8), jnp.float32).at[:, 0].set(cb)  # bias column
        a_list.append(jnp.concatenate([A[0], A[1], A[2], aug], axis=1))
        w_list += [p["lin0_w"].T.astype(jnp.bfloat16),
                   p["lin1_w"].T.astype(jnp.bfloat16)]
        b_list += [p["lin0_b"].reshape(1, -1), p["lin1_b"].reshape(1, -1)]
    return dict(
        A=jnp.stack(a_list),                                    # (2, CH, 3CH+8) f32
        W=jnp.stack(w_list),                                    # (4, 256, 256) bf16
        B=jnp.stack(b_list).astype(jnp.float32),                # (4, 1, 256)  f32
    )


# -----------------------------------------------------------------------------
# Pure-JAX reference (for verification)
# -----------------------------------------------------------------------------
def block_ref(p, x, constant=None):
    y = lax.conv_general_dilated(
        x, p["conv_w"], window_strides=(1, 1), padding="SAME",
        dimension_numbers=("NCHW", "OIHW", "NCHW"))
    y = y + p["conv_b"][None, :, None, None]
    y = jnp.einsum("nchw,ow->ncho", y, p["lin0_w"]) + p["lin0_b"]
    # x.add(constant) is a no-op
    y = jnp.einsum("nchw,ow->ncho", y, p["lin1_w"]) + p["lin1_b"]
    return jnp.maximum(y, 0.0)


def m_ref(p0, p1, x, constant=None):
    return block_ref(p1, block_ref(p0, x, constant), constant)


if __name__ == "__main__":
    key = jax.random.PRNGKey(0)
    kx, k0, k1 = jax.random.split(key, 3)

    # Shapes implied by the module: C=16 (conv), last dim W=256 (Linear 256->256).
    N, C, H, W = 2, 16, 4, 256
    x = jax.random.normal(kx, (N, C, H, W), jnp.float32)
    constant = jnp.float32(1.0)  # unused by semantics (no-op add)

    params0 = init_block(k0)
    params1 = init_block(k1)
    prep = prepare_weights(params0, params1, H)

    fold = not _has_multiple_tensorcores()
    out = jax.block_until_ready(m_forward_jit(prep, x, constant, fold_batch=fold))
    ref = jax.block_until_ready(m_ref(params0, params1, x, constant))

    assert out.shape == (N, C, H, W)
    max_diff = float(jnp.max(jnp.abs(out - ref)))
    # bf16 weight storage + bf16 MXU passes vs f32 reference: allow 5e-3.
    assert jnp.allclose(out, ref, atol=5e-3, rtol=5e-3), \
        f"max abs diff {max_diff}"

    print("KERNEL_OK")
</pallas_src>

<mosaic_0001>
module attributes {stable_mosaic.version = 11 : i64} {
  func.func @_m_fused_kernel(%arg0: i32, %arg1: memref<2x64x256xf32, #tpu.memory_space<vmem>>, %arg2: memref<2x64x200xf32, #tpu.memory_space<vmem>>, %arg3: memref<4x256x256xbf16, #tpu.memory_space<vmem>>, %arg4: memref<4x1x256xf32, #tpu.memory_space<vmem>>, %arg5: memref<2x64x256xf32, #tpu.memory_space<vmem>>) attributes {dimension_semantics = [#tpu.dimension_semantics<parallel>], iteration_bounds = array<i64: 1>, scalar_prefetch = 0 : i64, scratch_operands = 0 : i64, tpu.core_type = #tpu.core_type<tc>, window_params = [{transform_indices = @transform_0, window_bounds = array<i64: 2, 64, 256>}, {pipeline_mode = #tpu.pipeline_mode<synchronous>, transform_indices = @transform_1, window_bounds = array<i64: 2, 64, 200>}, {pipeline_mode = #tpu.pipeline_mode<synchronous>, transform_indices = @transform_2, window_bounds = array<i64: 4, 256, 256>}, {pipeline_mode = #tpu.pipeline_mode<synchronous>, transform_indices = @transform_3, window_bounds = array<i64: 4, 1, 256>}, {transform_indices = @transform_4, window_bounds = array<i64: 2, 64, 256>}]} {
    %c0 = arith.constant 0 : index
    %c0_0 = arith.constant 0 : index
    %c0_1 = arith.constant 0 : index
    %0 = vector.load %arg1[%c0, %c0_0, %c0_1] : memref<2x64x256xf32, #tpu.memory_space<vmem>>, vector<2x64x256xf32>
    %1 = vector.shape_cast %0 : vector<2x64x256xf32> to vector<128x256xf32>
    %2 = tpu.iota {dimensions = array<i32: 1>} : vector<128x256xi32>
    %c0_i32 = arith.constant 0 : i32
    %3 = vector.broadcast %c0_i32 : i32 to vector<128x256xi32>
    %4 = arith.cmpi eq, %2, %3 : vector<128x256xi32>
    %c255_i32 = arith.constant 255 : i32
    %5 = vector.broadcast %c255_i32 : i32 to vector<128x256xi32>
    %6 = arith.cmpi eq, %2, %5 : vector<128x256xi32>
    %7 = tpu.iota {dimensions = array<i32: 0>} : vector<8x256xi32>
    %c0_i32_2 = arith.constant 0 : i32
    %8 = vector.broadcast %c0_i32_2 : i32 to vector<8x256xi32>
    %9 = arith.cmpi eq, %7, %8 : vector<8x256xi32>
    %cst = arith.constant 1.000000e+00 : f32
    %cst_3 = arith.constant 0.000000e+00 : f32
    %10 = vector.broadcast %cst : f32 to vector<8x256xf32>
    %11 = vector.broadcast %cst_3 : f32 to vector<8x256xf32>
    %12 = arith.select %9, %10, %11 : vector<8x256xi1>, vector<8x256xf32>
    %c0_4 = arith.constant 0 : index
    %c0_5 = arith.constant 0 : index
    %c0_6 = arith.constant 0 : index
    %13 = vector.load %arg2[%c0_4, %c0_5, %c0_6] : memref<2x64x200xf32, #tpu.memory_space<vmem>>, vector<1x64x200xf32>
    %14 = vector.shape_cast %13 : vector<1x64x200xf32> to vector<64x200xf32>
    %c1_i32 = arith.constant 1 : i32
    %15 = tpu.dynamic_rotate %1 by %c1_i32 dim 1 : vector<128x256xf32>, i32 -> vector<128x256xf32>
    %cst_7 = arith.constant 0.000000e+00 : f32
    %16 = vector.broadcast %cst_7 : f32 to vector<128x256xf32>
    %17 = arith.select %4, %16, %15 : vector<128x256xi1>, vector<128x256xf32>
    %c255_i32_8 = arith.constant 255 : i32
    %18 = tpu.dynamic_rotate %1 by %c255_i32_8 dim 1 : vector<128x256xf32>, i32 -> vector<128x256xf32>
    %cst_9 = arith.constant 0.000000e+00 : f32
    %19 = vector.broadcast %cst_9 : f32 to vector<128x256xf32>
    %20 = arith.select %6, %19, %18 : vector<128x256xi1>, vector<128x256xf32>
    %21 = vector.extract_strided_slice %17 {offsets = [0, 0], sizes = [64, 256], strides = [1, 1]} : vector<128x256xf32> to vector<64x256xf32>
    %22 = vector.extract_strided_slice %1 {offsets = [0, 0], sizes = [64, 256], strides = [1, 1]} : vector<128x256xf32> to vector<64x256xf32>
    %23 = vector.extract_strided_slice %20 {offsets = [0, 0], sizes = [64, 256], strides = [1, 1]} : vector<128x256xf32> to vector<64x256xf32>
    %24 = tpu.concatenate %21, %22, %23, %12 in 0 : vector<64x256xf32>, vector<64x256xf32>, vector<64x256xf32>, vector<8x256xf32> -> vector<200x256xf32>
    %cst_10 = arith.constant dense<0.000000e+00> : vector<64x256xf32>
    %25 = tpu.matmul %14, %24, %cst_10 {dimension_numbers = #tpu.dot_dimension_numbers<[1], [0], [0], [1], [0, 0, 1, 1], [], []>} : vector<64x200xf32>, vector<200x256xf32>, vector<64x256xf32> -> vector<64x256xf32>
    %26 = vector.extract_strided_slice %17 {offsets = [64, 0], sizes = [64, 256], strides = [1, 1]} : vector<128x256xf32> to vector<64x256xf32>
    %27 = vector.extract_strided_slice %1 {offsets = [64, 0], sizes = [64, 256], strides = [1, 1]} : vector<128x256xf32> to vector<64x256xf32>
    %28 = vector.extract_strided_slice %20 {offsets = [64, 0], sizes = [64, 256], strides = [1, 1]} : vector<128x256xf32> to vector<64x256xf32>
    %29 = tpu.concatenate %26, %27, %28, %12 in 0 : vector<64x256xf32>, vector<64x256xf32>, vector<64x256xf32>, vector<8x256xf32> -> vector<200x256xf32>
    %cst_11 = arith.constant dense<0.000000e+00> : vector<64x256xf32>
    %30 = tpu.matmul %14, %29, %cst_11 {dimension_numbers = #tpu.dot_dimension_numbers<[1], [0], [0], [1], [0, 0, 1, 1], [], []>} : vector<64x200xf32>, vector<200x256xf32>, vector<64x256xf32> -> vector<64x256xf32>
    %31 = tpu.concatenate %25, %30 in 0 : vector<64x256xf32>, vector<64x256xf32> -> vector<128x256xf32>
    %32 = arith.truncf %31 : vector<128x256xf32> to vector<128x256xbf16>
    %c0_12 = arith.constant 0 : index
    %c0_13 = arith.constant 0 : index
    %c0_14 = arith.constant 0 : index
    %33 = vector.load %arg3[%c0_12, %c0_13, %c0_14] : memref<4x256x256xbf16, #tpu.memory_space<vmem>>, vector<1x256x256xbf16>
    %34 = vector.shape_cast %33 : vector<1x256x256xbf16> to vector<256x256xbf16>
    %cst_15 = arith.constant dense<0.000000e+00> : vector<128x256xf32>
    %35 = tpu.matmul %32, %34, %cst_15 {dimension_numbers = #tpu.dot_dimension_numbers<[1], [0], [0], [1], [0, 0, 1, 1], [], []>} : vector<128x256xbf16>, vector<256x256xbf16>, vector<128x256xf32> -> vector<128x256xf32>
    %c0_16 = arith.constant 0 : index
    %c0_17 = arith.constant 0 : index
    %c0_18 = arith.constant 0 : index
    %36 = vector.load %arg4[%c0_16, %c0_17, %c0_18] : memref<4x1x256xf32, #tpu.memory_space<vmem>>, vector<1x1x256xf32>
    %37 = vector.shape_cast %36 : vector<1x1x256xf32> to vector<1x256xf32>
    %38 = vector.broadcast %37 : vector<1x256xf32> to vector<128x256xf32>
    %39 = arith.addf %35, %38 : vector<128x256xf32>
    %40 = arith.truncf %39 : vector<128x256xf32> to vector<128x256xbf16>
    %c1 = arith.constant 1 : index
    %c0_19 = arith.constant 0 : index
    %c0_20 = arith.constant 0 : index
    %41 = vector.load %arg3[%c1, %c0_19, %c0_20] : memref<4x256x256xbf16, #tpu.memory_space<vmem>>, vector<1x256x256xbf16>
    %42 = vector.shape_cast %41 : vector<1x256x256xbf16> to vector<256x256xbf16>
    %cst_21 = arith.constant dense<0.000000e+00> : vector<128x256xf32>
    %43 = tpu.matmul %40, %42, %cst_21 {dimension_numbers = #tpu.dot_dimension_numbers<[1], [0], [0], [1], [0, 0, 1, 1], [], []>} : vector<128x256xbf16>, vector<256x256xbf16>, vector<128x256xf32> -> vector<128x256xf32>
    %c1_22 = arith.constant 1 : index
    %c0_23 = arith.constant 0 : index
    %c0_24 = arith.constant 0 : index
    %44 = vector.load %arg4[%c1_22, %c0_23, %c0_24] : memref<4x1x256xf32, #tpu.memory_space<vmem>>, vector<1x1x256xf32>
    %45 = vector.shape_cast %44 : vector<1x1x256xf32> to vector<1x256xf32>
    %46 = vector.broadcast %45 : vector<1x256xf32> to vector<128x256xf32>
    %47 = arith.addf %43, %46 : vector<128x256xf32>
    %cst_25 = arith.constant 0.000000e+00 : f32
    %48 = vector.broadcast %cst_25 : f32 to vector<128x256xf32>
    %49 = arith.maximumf %47, %48 : vector<128x256xf32>
    %c1_26 = arith.constant 1 : index
    %c0_27 = arith.constant 0 : index
    %c0_28 = arith.constant 0 : index
    %50 = vector.load %arg2[%c1_26, %c0_27, %c0_28] : memref<2x64x200xf32, #tpu.memory_space<vmem>>, vector<1x64x200xf32>
    %51 = vector.shape_cast %50 : vector<1x64x200xf32> to vector<64x200xf32>
    %c1_i32_29 = arith.constant 1 : i32
    %52 = tpu.dynamic_rotate %49 by %c1_i32_29 dim 1 : vector<128x256xf32>, i32 -> vector<128x256xf32>
    %cst_30 = arith.constant 0.000000e+00 : f32
    %53 = vector.broadcast %cst_30 : f32 to vector<128x256xf32>
    %54 = arith.select %4, %53, %52 : vector<128x256xi1>, vector<128x256xf32>
    %c255_i32_31 = arith.constant 255 : i32
    %55 = tpu.dynamic_rotate %49 by %c255_i32_31 dim 1 : vector<128x256xf32>, i32 -> vector<128x256xf32>
    %cst_32 = arith.constant 0.000000e+00 : f32
    %56 = vector.broadcast %cst_32 : f32 to vector<128x256xf32>
    %57 = arith.select %6, %56, %55 : vector<128x256xi1>, vector<128x256xf32>
    %58 = vector.extract_strided_slice %54 {offsets = [0, 0], sizes = [64, 256], strides = [1, 1]} : vector<128x256xf32> to vector<64x256xf32>
    %59 = vector.extract_strided_slice %49 {offsets = [0, 0], sizes = [64, 256], strides = [1, 1]} : vector<128x256xf32> to vector<64x256xf32>
    %60 = vector.extract_strided_slice %57 {offsets = [0, 0], sizes = [64, 256], strides = [1, 1]} : vector<128x256xf32> to vector<64x256xf32>
    %61 = tpu.concatenate %58, %59, %60, %12 in 0 : vector<64x256xf32>, vector<64x256xf32>, vector<64x256xf32>, vector<8x256xf32> -> vector<200x256xf32>
    %cst_33 = arith.constant dense<0.000000e+00> : vector<64x256xf32>
    %62 = tpu.matmul %51, %61, %cst_33 {dimension_numbers = #tpu.dot_dimension_numbers<[1], [0], [0], [1], [0, 0, 1, 1], [], []>} : vector<64x200xf32>, vector<200x256xf32>, vector<64x256xf32> -> vector<64x256xf32>
    %63 = vector.extract_strided_slice %54 {offsets = [64, 0], sizes = [64, 256], strides = [1, 1]} : vector<128x256xf32> to vector<64x256xf32>
    %64 = vector.extract_strided_slice %49 {offsets = [64, 0], sizes = [64, 256], strides = [1, 1]} : vector<128x256xf32> to vector<64x256xf32>
    %65 = vector.extract_strided_slice %57 {offsets = [64, 0], sizes = [64, 256], strides = [1, 1]} : vector<128x256xf32> to vector<64x256xf32>
    %66 = tpu.concatenate %63, %64, %65, %12 in 0 : vector<64x256xf32>, vector<64x256xf32>, vector<64x256xf32>, vector<8x256xf32> -> vector<200x256xf32>
    %cst_34 = arith.constant dense<0.000000e+00> : vector<64x256xf32>
    %67 = tpu.matmul %51, %66, %cst_34 {dimension_numbers = #tpu.dot_dimension_numbers<[1], [0], [0], [1], [0, 0, 1, 1], [], []>} : vector<64x200xf32>, vector<200x256xf32>, vector<64x256xf32> -> vector<64x256xf32>
    %68 = tpu.concatenate %62, %67 in 0 : vector<64x256xf32>, vector<64x256xf32> -> vector<128x256xf32>
    %69 = arith.truncf %68 : vector<128x256xf32> to vector<128x256xbf16>
    %c2 = arith.constant 2 : index
    %c0_35 = arith.constant 0 : index
    %c0_36 = arith.constant 0 : index
    %70 = vector.load %arg3[%c2, %c0_35, %c0_36] : memref<4x256x256xbf16, #tpu.memory_space<vmem>>, vector<1x256x256xbf16>
    %71 = vector.shape_cast %70 : vector<1x256x256xbf16> to vector<256x256xbf16>
    %cst_37 = arith.constant dense<0.000000e+00> : vector<128x256xf32>
    %72 = tpu.matmul %69, %71, %cst_37 {dimension_numbers = #tpu.dot_dimension_numbers<[1], [0], [0], [1], [0, 0, 1, 1], [], []>} : vector<128x256xbf16>, vector<256x256xbf16>, vector<128x256xf32> -> vector<128x256xf32>
    %c2_38 = arith.constant 2 : index
    %c0_39 = arith.constant 0 : index
    %c0_40 = arith.constant 0 : index
    %73 = vector.load %arg4[%c2_38, %c0_39, %c0_40] : memref<4x1x256xf32, #tpu.memory_space<vmem>>, vector<1x1x256xf32>
    %74 = vector.shape_cast %73 : vector<1x1x256xf32> to vector<1x256xf32>
    %75 = vector.broadcast %74 : vector<1x256xf32> to vector<128x256xf32>
    %76 = arith.addf %72, %75 : vector<128x256xf32>
    %77 = arith.truncf %76 : vector<128x256xf32> to vector<128x256xbf16>
    %c3 = arith.constant 3 : index
    %c0_41 = arith.constant 0 : index
    %c0_42 = arith.constant 0 : index
    %78 = vector.load %arg3[%c3, %c0_41, %c0_42] : memref<4x256x256xbf16, #tpu.memory_space<vmem>>, vector<1x256x256xbf16>
    %79 = vector.shape_cast %78 : vector<1x256x256xbf16> to vector<256x256xbf16>
    %cst_43 = arith.constant dense<0.000000e+00> : vector<128x256xf32>
    %80 = tpu.matmul %77, %79, %cst_43 {dimension_numbers = #tpu.dot_dimension_numbers<[1], [0], [0], [1], [0, 0, 1, 1], [], []>} : vector<128x256xbf16>, vector<256x256xbf16>, vector<128x256xf32> -> vector<128x256xf32>
    %c3_44 = arith.constant 3 : index
    %c0_45 = arith.constant 0 : index
    %c0_46 = arith.constant 0 : index
    %81 = vector.load %arg4[%c3_44, %c0_45, %c0_46] : memref<4x1x256xf32, #tpu.memory_space<vmem>>, vector<1x1x256xf32>
    %82 = vector.shape_cast %81 : vector<1x1x256xf32> to vector<1x256xf32>
    %83 = vector.broadcast %82 : vector<1x256xf32> to vector<128x256xf32>
    %84 = arith.addf %80, %83 : vector<128x256xf32>
    %cst_47 = arith.constant 0.000000e+00 : f32
    %85 = vector.broadcast %cst_47 : f32 to vector<128x256xf32>
    %86 = arith.maximumf %84, %85 : vector<128x256xf32>
    %87 = vector.shape_cast %86 : vector<128x256xf32> to vector<2x64x256xf32>
    %c0_48 = arith.constant 0 : index
    %c0_49 = arith.constant 0 : index
    %c0_50 = arith.constant 0 : index
    %88 = vector.load %arg5[%c0_48, %c0_49, %c0_50] : memref<2x64x256xf32, #tpu.memory_space<vmem>>, vector<2x64x256xf32>
    tpu.vector_store %arg5[%c0_48, %c0_49, %c0_50], %87 {strides = array<i32>} : memref<2x64x256xf32, #tpu.memory_space<vmem>>, vector<2x64x256xf32>,
    return
  }
  func.func @transform_0(%arg0: i32) -> (i32, i32, i32) {
    %c0_i32 = arith.constant 0 : i32
    %c0_i32_0 = arith.constant 0 : i32
    %c0_i32_1 = arith.constant 0 : i32
    return %arg0, %c0_i32, %c0_i32_0 : i32, i32, i32
  }
  func.func @transform_1(%arg0: i32) -> (i32, i32, i32) {
    %c0_i32 = arith.constant 0 : i32
    %c0_i32_0 = arith.constant 0 : i32
    %c0_i32_1 = arith.constant 0 : i32
    %c0_i32_2 = arith.constant 0 : i32
    return %c0_i32, %c0_i32_0, %c0_i32_1 : i32, i32, i32
  }
  func.func @transform_2(%arg0: i32) -> (i32, i32, i32) {
    %c0_i32 = arith.constant 0 : i32
    %c0_i32_0 = arith.constant 0 : i32
    %c0_i32_1 = arith.constant 0 : i32
    %c0_i32_2 = arith.constant 0 : i32
    return %c0_i32, %c0_i32_0, %c0_i32_1 : i32, i32, i32
  }
  func.func @transform_3(%arg0: i32) -> (i32, i32, i32) {
    %c0_i32 = arith.constant 0 : i32
    %c0_i32_0 = arith.constant 0 : i32
    %c0_i32_1 = arith.constant 0 : i32
    %c0_i32_2 = arith.constant 0 : i32
    return %c0_i32, %c0_i32_0, %c0_i32_1 : i32, i32, i32
  }
  func.func @transform_4(%arg0: i32) -> (i32, i32, i32) {
    %c0_i32 = arith.constant 0 : i32
    %c0_i32_0 = arith.constant 0 : i32
    %c0_i32_1 = arith.constant 0 : i32
    return %arg0, %c0_i32, %c0_i32_0 : i32, i32, i32
  }
}

</mosaic_0001>

<bundles_post_ra>
// kernel: m_forward.1
= control target key start
LH: loop header
LB: loop body
LE: loop exit
PB: predicated region body
PF: predicated region fallthrough
CT: control target
= control target key end

     0   :  { %9 = vsyncpa [#allocation3], 0  ;;  %s3098_s15 = smov [#allocation2]   ;;  %s4561_s0 = inlined_call_operand.vmem [shape: f32[2,64,256], index: 0, kind: input, shape index: {}]   ;;  %s4562_s1 = inlined_call_operand.vmem [shape: f32[2,64,200], index: 1, kind: input, shape index: {}]   ;;  %s4563_s2 = inlined_call_operand.hbm [shape: bf16[4,256,256], index: 2, kind: input, shape index: {}]   ;;  %s4564_s3 = inlined_call_operand.vmem [shape: f32[4,1,256], index: 3, kind: input, shape index: {}]   ;;  %s4565_s4 = inlined_call_operand.vmem [shape: f32[2,64,256], index: 4, kind: output, shape index: {}]  }
   0x1   :  { %s19_s16 = sshll.u32 %s3098_s15, 4  ;;  %s20_s16 = int_to_ptr.vmem [resolvable:$true] %s19_s16 }
   0x2   :  { %s3084_s17 = scalar_lea.vmem %s20_s16, 16384  ;;  %p3089_p1 = scmp.lt.s32.totalorder %s20_s16, %s20_s16 }
   0x3   :  { %p3085_p0 = scmp.ne.s32.totalorder %s20_s16, %s3084_s17  ;;  %p3090_p2 = scmp.lt.s32.totalorder %s3084_s17, %s3084_s17 }
   0x5   :  { %p3091_p3 = por %p3090_p2, %p3089_p1 }
   0x7   :  { %p3092_p4 = pnand %p3091_p3, %p3085_p0 }
   0x9   :  { %3095 = shalt.err (!%p3092_p4)
}
   0xa   :  { %s3099_s18 = smov 128   ;;  %s3100_s19 = smov 8  }
   0xb   :  { %25 = dma.hbm_to_vmem [thread:$0]  %s4563_s2, 16384, %s20_s16, [#allocation3], %s3099_s18, %s3099_s18, %s3100_s19  }
   0xc   :  { %3096 = dma.done.wait [#allocation3], 16384  }
   0xd   :  { %3097 = vsyncadd [#allocation3], 4294950912  ;;  %v3135_v0 = vld [vmem:[%s4561_s0 + $0x70] sm:$0xff]  ;;  %v3140_v1 = vld [vmem:[%s4561_s0 + $0x60] sm:$0xff]  ;;  %s3101_s26 = smov 1   ;;  %s3102_s8 = smov 127   ;;  %v63_v33 = vlaneseq }
   0xe   :  { %104 = vrot.lane.b32.xlu0 %v3135_v0, %s3101_s26  ;;  %102 = vrot.lane.b32.xlu1 %v3140_v1, %s3101_s26  ;;  %v3149_v2 = vld [vmem:[%s4561_s0 + $0x78] sm:$0xff]  ;;  %v3154_v3 = vld [vmem:[%s4561_s0 + $0x68] sm:$0xff]  ;;  %vm348_vm0 = vcmask 588800  }
   0xf   :  { %373 = vmatprep.subr.mxu0 %v3149_v2  ;;  %v3166_v4 = vld [vmem:[%s4561_s0 + $0x58] sm:$0xff]  ;;  %v3171_v5 = vld [vmem:[%s4561_s0 + $0x50] sm:$0xff]  ;;  %v3195_v8 = vld [vmem:[%s4561_s0 + $0x48] sm:$0xff]  ;;  %v3410_v34 = vand.u32 127, %v63_v33  ;;  %v3466_v63 = vshrl.u32 %v63_v33, 7 }
  0x10   :  { %374 = vmatpush1.msra.mxu0 %v3135_v0  ;;  %v3176_v6 = vld [vmem:[%s4561_s0 + $0xf8] sm:$0xff]  ;;  %v3182_v7 = vld [vmem:[%s4561_s0 + $0xf0] sm:$0xff]  ;;  %v3200_v9 = vld [vmem:[%s4561_s0 + $0xe8] sm:$0xff] }
  0x11   :  { %375 = vmatprep.subr.mxu0 %v3154_v3  ;;  %486 = vmatprep.subr.mxu1 %v3176_v6  ;;  %v3205_v10 = vld [vmem:[%s4561_s0 + $0x40] sm:$0xff]  ;;  %v3210_v11 = vld [vmem:[%s4561_s0 + $0x38] sm:$0xff]  ;;  %v37_v13 = vld [vmem:[%s4561_s0 + $0x30] sm:$0xff]  ;;  %vm154_vm1 = vcmp.lt.s32.totalorder %v3410_v34, 1  ;;  %vm2876_vm2 = vcmp.ne.s32.totalorder %v3410_v34, 0  ;;  %vm72_vm3 = vcmp.eq.s32.totalorder %v3466_v63, 0 }
  0x12   :  { %136 = vrot.lane.b32.xlu0 %v3149_v2, %s3101_s26  ;;  %134 = vrot.lane.b32.xlu1 %v3154_v3, %s3101_s26  ;;  %v3215_v12 = vld [vmem:[%s4561_s0 + $0xe0] sm:$0xff]  ;;  %v3225_v14 = vld [vmem:[%s4561_s0 + $0xd8] sm:$0xff]  ;;  %vm283_vm4 = vcmp.lt.s32.totalorder %v3410_v34, 127 }
  0x13   :  { %376 = vmatpush1.msra.mxu0 %v3140_v1  ;;  %487 = vmatpush1.msra.mxu1 %v3182_v7  ;;  %v3230_v15 = vld [vmem:[%s4561_s0 + $0xd0] sm:$0xff]  ;;  %v36_v16 = vld [vmem:[%s4561_s0 + $0x28] sm:$0xff]  ;;  %v35_v18 = vld [vmem:[%s4561_s0 + $0x20] sm:$0xff] }
  0x14   :  { %377 = vmatprep.subr.mxu0 %v3166_v4  ;;  %488 = vmatprep.subr.mxu1 %v3200_v9  ;;  %v3240_v17 = vld [vmem:[%s4561_s0 + $0xc8] sm:$0xff]  ;;  %v3254_v19 = vld [vmem:[%s4561_s0 + $0xc0] sm:$0xff]  ;;  %v34_v20 = vld [vmem:[%s4561_s0 + $0x18] sm:$0xff] }
  0x15   :  { %378 = vmatpush1.msra.mxu0 %v3171_v5  ;;  %489 = vmatpush1.msra.mxu1 %v3215_v12  ;;  %v3263_v21 = vld [vmem:[%s4561_s0 + $0xb8] sm:$0xff]  ;;  %v33_v22 = vld [vmem:[%s4561_s0 + $0x10] sm:$0xff]  ;;  %v32_v24 = vld [vmem:[%s4561_s0 + $0x8] sm:$0xff] }
  0x16   :  { %132 = vrot.lane.b32.xlu1 %v3166_v4, %s3101_s26  ;;  %100 = vrot.lane.b32.xlu0 %v3171_v5, %s3101_s26  ;;  %v3272_v23 = vld [vmem:[%s4561_s0 + $0xb0] sm:$0xff]  ;;  %v3285_v25 = vld [vmem:[%s4561_s0 + $0xa8] sm:$0xff] }
  0x17   :  { %379 = vmatprep.subr.mxu0 %v3195_v8  ;;  %490 = vmatprep.subr.mxu1 %v3225_v14  ;;  %v31_v26 = vld [vmem:[%s4561_s0] sm:$0xff]  ;;  %v3302_v28 = vld [vmem:[%s4561_s0 + $0x98] sm:$0xff]  ;;  %v3307_v29 = vld [vmem:[%s4561_s0 + $0x90] sm:$0xff] }
  0x18   :  { %380 = vmatpush1.msra.mxu0 %v3205_v10  ;;  %491 = vmatpush1.msra.mxu1 %v3230_v15  ;;  %v3294_v27 = vld [vmem:[%s4561_s0 + $0xa0] sm:$0xff]  ;;  %v3313_v30 = vld [vmem:[%s4561_s0 + $0x88] sm:$0xff] }
  0x19   :  { %381 = vmatprep.subr.mxu0 %v3210_v11  ;;  %492 = vmatprep.subr.mxu1 %v3240_v17  ;;  %v3321_v31 = vld [vmem:[%s4561_s0 + $0x80] sm:$0xff]  ;;  %v75_v32 = vld [vmem:[%s4562_s1 + $0x8] sm:$0xff] }
  0x1a   :  { %130 = vrot.lane.b32.xlu1 %v3195_v8, %s3101_s26  ;;  %98 = vrot.lane.b32.xlu0 %v3205_v10, %s3101_s26 }
  0x1b   :  { %382 = vmatpush1.msra.mxu0 %v37_v13  ;;  %493 = vmatpush1.msra.mxu1 %v3254_v19 }
  0x1c   :  { %383 = vmatprep.subr.mxu0 %v36_v16  ;;  %494 = vmatprep.subr.mxu1 %v3263_v21 }
  0x1d   :  { %384 = vmatpush1.msra.mxu0 %v35_v18  ;;  %495 = vmatpush1.msra.mxu1 %v3272_v23 }
  0x1e   :  { %128 = vrot.lane.b32.xlu1 %v3210_v11, %s3101_s26  ;;  %96 = vrot.lane.b32.xlu0 %v37_v13, %s3101_s26 }
  0x1f   :  { %385 = vmatprep.subr.mxu0 %v34_v20  ;;  %496 = vmatprep.subr.mxu1 %v3285_v25 }
  0x20   :  { %386 = vmatpush1.msra.mxu0 %v33_v22  ;;  %497 = vmatpush1.msra.mxu1 %v3294_v27 }
  0x21   :  { %387 = vmatprep.subr.mxu0 %v32_v24  ;;  %498 = vmatprep.subr.mxu1 %v3302_v28 }
  0x22   :  { %126 = vrot.lane.b32.xlu1 %v36_v16, %s3101_s26  ;;  %94 = vrot.lane.b32.xlu0 %v35_v18, %s3101_s26 }
  0x23   :  { %388 = vmatpush1.msra.mxu0 %v31_v26  ;;  %499 = vmatpush1.msra.mxu1 %v3307_v29 }
  0x24   :  { %500 = vmatprep.subr.mxu1 %v3313_v30  ;;  %2595 = vmatprep.mubr.msk.f32.mxu0 %vm348_vm0, %v75_v32 }
  0x25   :  { %501 = vmatpush1.msra.mxu1 %v3321_v31  ;;  %2637 = vmatprep.mubr.msk.f32.mxu1 %vm348_vm0, %v75_v32 }
  0x26   :  { %124 = vrot.lane.b32.xlu1 %v34_v20, %s3101_s26  ;;  %92 = vrot.lane.b32.xlu0 %v33_v22, %s3101_s26 }
  0x2a   :  { %122 = vrot.lane.b32.xlu1 %v32_v24, %s3101_s26  ;;  %90 = vrot.lane.b32.xlu0 %v31_v26, %s3101_s26 }
  0x2e   :  { %265 = vrot.lane.b32.xlu1 %v3149_v2, %s3102_s8  ;;  %233 = vrot.lane.b32.xlu0 %v3135_v0, %s3102_s8  ;;  %v3471_v0 = vadd.s32 128, %v3410_v34  ;;  %v3013_v34 = vld [vmem:[#allocation2 + $0x2c0] ss:$8 sps:$4 sm:$0xff]  }
  0x30   :  { %vm2877_vm5 = vcmp.ne.s32.totalorder %v3471_v0, 255  ;;  %v3018_v0 = vld [vmem:[#allocation2 + $0x2b4] ss:$8 sps:$4 sm:$0xff]  }
  0x32   :  { %263 = vrot.lane.b32.xlu1 %v3154_v3, %s3102_s8  ;;  %231 = vrot.lane.b32.xlu0 %v3140_v1, %s3102_s8 }
  0x36   :  { %261 = vrot.lane.b32.xlu1 %v3166_v4, %s3102_s8  ;;  %229 = vrot.lane.b32.xlu0 %v3171_v5, %s3102_s8 }
  0x3a   :  { %259 = vrot.lane.b32.xlu1 %v3195_v8, %s3102_s8  ;;  %227 = vrot.lane.b32.xlu0 %v3205_v10, %s3102_s8 }
  0x3e   :  { %257 = vrot.lane.b32.xlu1 %v3210_v11, %s3102_s8  ;;  %225 = vrot.lane.b32.xlu0 %v37_v13, %s3102_s8 }
  0x42   :  { %255 = vrot.lane.b32.xlu1 %v36_v16, %s3102_s8  ;;  %223 = vrot.lane.b32.xlu0 %v35_v18, %s3102_s8 }
  0x46   :  { %253 = vrot.lane.b32.xlu1 %v34_v20, %s3102_s8  ;;  %221 = vrot.lane.b32.xlu0 %v33_v22, %s3102_s8 }
  0x4a   :  { %152 = vrot.lane.b32.xlu1 %v3176_v6, %s3101_s26  ;;  %120 = vrot.lane.b32.xlu0 %v3182_v7, %s3101_s26 }
  0x4e   :  { %251 = vrot.lane.b32.xlu1 %v32_v24, %s3102_s8  ;;  %219 = vrot.lane.b32.xlu0 %v31_v26, %s3102_s8 }
  0x52   :  { %150 = vrot.lane.b32.xlu1 %v3200_v9, %s3101_s26  ;;  %118 = vrot.lane.b32.xlu0 %v3215_v12, %s3101_s26 }
  0x56   :  { %148 = vrot.lane.b32.xlu1 %v3225_v14, %s3101_s26  ;;  %116 = vrot.lane.b32.xlu0 %v3230_v15, %s3101_s26 }
  0x5a   :  { %146 = vrot.lane.b32.xlu1 %v3240_v17, %s3101_s26  ;;  %114 = vrot.lane.b32.xlu0 %v3254_v19, %s3101_s26 }
  0x5e   :  { %144 = vrot.lane.b32.xlu1 %v3263_v21, %s3101_s26  ;;  %112 = vrot.lane.b32.xlu0 %v3272_v23, %s3101_s26 }
  0x62   :  { %142 = vrot.lane.b32.xlu1 %v3285_v25, %s3101_s26  ;;  %110 = vrot.lane.b32.xlu0 %v3294_v27, %s3101_s26 }
  0x66   :  { %140 = vrot.lane.b32.xlu1 %v3302_v28, %s3101_s26  ;;  %108 = vrot.lane.b32.xlu0 %v3307_v29, %s3101_s26 }
  0x6a   :  { %138 = vrot.lane.b32.xlu1 %v3313_v30, %s3101_s26  ;;  %106 = vrot.lane.b32.xlu0 %v3321_v31, %s3101_s26 }
  0x6e   :  { %281 = vrot.lane.b32.xlu1 %v3176_v6, %s3102_s8  ;;  %249 = vrot.lane.b32.xlu0 %v3182_v7, %s3102_s8  ;;  %v3103_v7 = vmov 1.0  }
  0x72   :  { %279 = vrot.lane.b32.xlu1 %v3200_v9, %s3102_s8  ;;  %247 = vrot.lane.b32.xlu0 %v3215_v12, %s3102_s8 }
  0x76   :  { %277 = vrot.lane.b32.xlu1 %v3225_v14, %s3102_s8  ;;  %245 = vrot.lane.b32.xlu0 %v3230_v15, %s3102_s8 }
  0x7a   :  { %275 = vrot.lane.b32.xlu1 %v3240_v17, %s3102_s8  ;;  %243 = vrot.lane.b32.xlu0 %v3254_v19, %s3102_s8 }
  0x7e   :  { %273 = vrot.lane.b32.xlu1 %v3263_v21, %s3102_s8  ;;  %241 = vrot.lane.b32.xlu0 %v3272_v23, %s3102_s8 }
  0x80   :  { %v105_v35 = vpop.permute.xlu0 %104  ;;  %v103_v36 = vpop.permute.xlu1 %102 }
  0x82   :  { %271 = vrot.lane.b32.xlu1 %v3285_v25, %s3102_s8  ;;  %239 = vrot.lane.b32.xlu0 %v3294_v27, %s3102_s8 }
  0x84   :  { %v137_v37 = vpop.permute.xlu0 %136  ;;  %v135_v38 = vpop.permute.xlu1 %134 }
  0x85   :  { %v162_v39 = vsel %vm154_vm1, %v105_v35, %v137_v37  ;;  %v178_v40 = vsel %vm154_vm1, %v137_v37, %v105_v35  ;;  %v161_v43 = vsel %vm154_vm1, %v103_v36, %v135_v38  ;;  %v177_v44 = vsel %vm154_vm1, %v135_v38, %v103_v36 }
  0x86   :  { %269 = vrot.lane.b32.xlu1 %v3302_v28, %s3102_s8  ;;  %237 = vrot.lane.b32.xlu0 %v3307_v29, %s3102_s8 }
  0x87   :  { %389 = vmatprep.subr.mxu0 %v162_v39 }
  0x88   :  { %2562 = vmatpush1.msk.msra.mxu0 %vm2876_vm2, %v178_v40  ;;  %v133_v41 = vpop.permute.xlu1 %132  ;;  %v101_v42 = vpop.permute.xlu0 %100 }
  0x89   :  { %391 = vmatprep.subr.mxu0 %v161_v43  ;;  %v160_v45 = vsel %vm154_vm1, %v101_v42, %v133_v41  ;;  %v176_v46 = vsel %vm154_vm1, %v133_v41, %v101_v42  ;;  %v2886_v41 = vld [vmem:[#allocation2 + $0x74] ss:$8 sps:$4 sm:$0xff]  }
  0x8a   :  { %2564 = vmatpush1.msk.msra.mxu0 %vm2876_vm2, %v177_v44  ;;  %267 = vrot.lane.b32.xlu1 %v3313_v30, %s3102_s8  ;;  %v3543_v44 = vld [vmem:[%s4562_s1] sm:$0xff] }
  0x8b   :  { %235 = vrot.lane.b32.xlu0 %v3321_v31, %s3102_s8  ;;  %393 = vmatprep.subr.mxu0 %v160_v45  ;;  %v2884_v45 = vld [vmem:[#allocation2 + $0x70] ss:$8 sps:$4 sm:$0xff]  }
  0x8c   :  { %2566 = vmatpush1.msk.msra.mxu0 %vm2876_vm2, %v176_v46  ;;  %v131_v47 = vpop.permute.xlu1 %130  ;;  %v99_v48 = vpop.permute.xlu0 %98  ;;  %v3550_v46 = vld [vmem:[%s4562_s1 + $0x18] sm:$0xff] }
  0x8d   :  { %v159_v49 = vsel %vm154_vm1, %v99_v48, %v131_v47  ;;  %v175_v50 = vsel %vm154_vm1, %v131_v47, %v99_v48  ;;  %v2889_v47 = vld [vmem:[#allocation2 + $0x64] ss:$8 sps:$4 sm:$0xff]  }
  0x8e   :  { %395 = vmatprep.subr.mxu0 %v159_v49 }
  0x8f   :  { %2568 = vmatpush1.msk.msra.mxu0 %vm2876_vm2, %v175_v50 }
  0x90   :  { %v129_v51 = vpop.permute.xlu1 %128  ;;  %v97_v52 = vpop.permute.xlu0 %96 }
  0x91   :  { %v158_v53 = vsel %vm154_vm1, %v97_v52, %v129_v51  ;;  %v174_v54 = vsel %vm154_vm1, %v129_v51, %v97_v52  ;;  %v3560_v51 = vld [vmem:[%s4562_s1 + $0x10] sm:$0xff] }
  0x92   :  { %397 = vmatprep.subr.mxu0 %v158_v53  ;;  %v2887_v53 = vld [vmem:[#allocation2 + $0x60] ss:$8 sps:$4 sm:$0xff]  }
  0x93   :  { %2570 = vmatpush1.msk.msra.mxu0 %vm2876_vm2, %v174_v54  ;;  %v3567_v54 = vld [vmem:[%s4562_s1 + $0x28] sm:$0xff] }
  0x94   :  { %v127_v55 = vpop.permute.xlu1 %126  ;;  %v95_v56 = vpop.permute.xlu0 %94 }
  0x95   :  { %v157_v57 = vsel %vm154_vm1, %v95_v56, %v127_v55  ;;  %v173_v58 = vsel %vm154_vm1, %v127_v55, %v95_v56  ;;  %v2892_v55 = vld [vmem:[#allocation2 + $0x54] ss:$8 sps:$4 sm:$0xff]  }
  0x96   :  { %399 = vmatprep.subr.mxu0 %v157_v57 }
  0x97   :  { %2572 = vmatpush1.msk.msra.mxu0 %vm2876_vm2, %v173_v58 }
  0x98   :  { %v125_v59 = vpop.permute.xlu1 %124  ;;  %v93_v60 = vpop.permute.xlu0 %92 }
  0x99   :  { %v156_v61 = vsel %vm154_vm1, %v93_v60, %v125_v59  ;;  %v172_v62 = vsel %vm154_vm1, %v125_v59, %v93_v60  ;;  %v3579_v59 = vld [vmem:[%s4562_s1 + $0x20] sm:$0xff] }
  0x9a   :  { %401 = vmatprep.subr.mxu0 %v156_v61  ;;  %v2890_v61 = vld [vmem:[#allocation2 + $0x50] ss:$8 sps:$4 sm:$0xff]  }
  0x9b   :  { %2574 = vmatpush1.msk.msra.mxu0 %vm2876_vm2, %v172_v62  ;;  %v3586_v62 = vld [vmem:[%s4562_s1 + $0x38] sm:$0xff] }
  0x9c   :  { %v123_v1 = vpop.permute.xlu1 %122  ;;  %v91_v2 = vpop.permute.xlu0 %90 }
  0x9d   :  { %v155_v3 = vsel %vm154_vm1, %v91_v2, %v123_v1  ;;  %v171_v4 = vsel %vm154_vm1, %v123_v1, %v91_v2  ;;  %v2895_v1 = vld [vmem:[#allocation2 + $0x44] ss:$8 sps:$4 sm:$0xff]  }
  0x9e   :  { %403 = vmatprep.subr.mxu0 %v155_v3 }
  0x9f   :  { %2576 = vmatpush1.msk.msra.mxu0 %vm2876_vm2, %v171_v4 }
  0xa0   :  { %v266_v5 = vpop.permute.xlu1 %265  ;;  %v234_v6 = vpop.permute.xlu0 %233  ;;  %2577 = vmatprep.subr.msk.mxu0 %vm72_vm3, %v3103_v7 }
  0xa1   :  { %2578 = vmatpush2.msk.msra.mxu0 %vm72_vm3, %v3103_v7  ;;  %v307_v8 = vsel %vm283_vm4, %v266_v5, %v234_v6  ;;  %v291_v9 = vsel %vm283_vm4, %v234_v6, %v266_v5  ;;  %v3598_v5 = vld [vmem:[%s4562_s1 + $0x30] sm:$0xff] }
  0xa2   :  { %2580 = vmatprep.subr.msk.mxu0 %vm2877_vm5, %v307_v8  ;;  %v2893_v8 = vld [vmem:[#allocation2 + $0x40] ss:$8 sps:$4 sm:$0xff]  }
  0xa3   :  { %422 = vmatpush2.msra.mxu0 %v291_v9  ;;  %v3605_v9 = vld [vmem:[%s4562_s1 + $0x48] sm:$0xff] }
  0xa4   :  { %v264_v10 = vpop.permute.xlu1 %263  ;;  %v232_v11 = vpop.permute.xlu0 %231 }
  0xa5   :  { %v306_v12 = vsel %vm283_vm4, %v264_v10, %v232_v11  ;;  %v290_v13 = vsel %vm283_vm4, %v232_v11, %v264_v10  ;;  %v2898_v10 = vld [vmem:[#allocation2 + $0x34] ss:$8 sps:$4 sm:$0xff]  }
  0xa6   :  { %2582 = vmatprep.subr.msk.mxu0 %vm2877_vm5, %v306_v12 }
  0xa7   :  { %424 = vmatpush2.msra.mxu0 %v290_v13 }
  0xa8   :  { %v262_v14 = vpop.permute.xlu1 %261  ;;  %v230_v15 = vpop.permute.xlu0 %229 }
  0xa9   :  { %v305_v16 = vsel %vm283_vm4, %v262_v14, %v230_v15  ;;  %v289_v17 = vsel %vm283_vm4, %v230_v15, %v262_v14  ;;  %v3617_v14 = vld [vmem:[%s4562_s1 + $0x40] sm:$0xff] }
  0xaa   :  { %2584 = vmatprep.subr.msk.mxu0 %vm2877_vm5, %v305_v16  ;;  %v2896_v16 = vld [vmem:[#allocation2 + $0x30] ss:$8 sps:$4 sm:$0xff]  }
  0xab   :  { %426 = vmatpush2.msra.mxu0 %v289_v17  ;;  %v3624_v17 = vld [vmem:[%s4562_s1 + $0x58] sm:$0xff] }
  0xac   :  { %v260_v18 = vpop.permute.xlu1 %259  ;;  %v228_v19 = vpop.permute.xlu0 %227 }
  0xad   :  { %v304_v20 = vsel %vm283_vm4, %v260_v18, %v228_v19  ;;  %v288_v21 = vsel %vm283_vm4, %v228_v19, %v260_v18  ;;  %v2901_v18 = vld [vmem:[#allocation2 + $0x24] ss:$8 sps:$4 sm:$0xff]  }
  0xae   :  { %2586 = vmatprep.subr.msk.mxu0 %vm2877_vm5, %v304_v20 }
  0xaf   :  { %428 = vmatpush2.msra.mxu0 %v288_v21 }
  0xb0   :  { %v258_v22 = vpop.permute.xlu1 %257  ;;  %v226_v23 = vpop.permute.xlu0 %225 }
  0xb1   :  { %v303_v24 = vsel %vm283_vm4, %v258_v22, %v226_v23  ;;  %v287_v25 = vsel %vm283_vm4, %v226_v23, %v258_v22  ;;  %v3636_v22 = vld [vmem:[%s4562_s1 + $0x50] sm:$0xff] }
  0xb2   :  { %2588 = vmatprep.subr.msk.mxu0 %vm2877_vm5, %v303_v24  ;;  %v2899_v24 = vld [vmem:[#allocation2 + $0x20] ss:$8 sps:$4 sm:$0xff]  }
  0xb3   :  { %430 = vmatpush2.msra.mxu0 %v287_v25  ;;  %v3643_v25 = vld [vmem:[%s4562_s1 + $0x68] sm:$0xff] }
  0xb4   :  { %v256_v26 = vpop.permute.xlu1 %255  ;;  %v224_v27 = vpop.permute.xlu0 %223 }
  0xb5   :  { %v302_v28 = vsel %vm283_vm4, %v256_v26, %v224_v27  ;;  %v286_v29 = vsel %vm283_vm4, %v224_v27, %v256_v26  ;;  %v2904_v26 = vld [vmem:[#allocation2 + $0x14] ss:$8 sps:$4 sm:$0xff]  }
  0xb6   :  { %2590 = vmatprep.subr.msk.mxu0 %vm2877_vm5, %v302_v28 }
  0xb7   :  { %432 = vmatpush2.msra.mxu0 %v286_v29 }
  0xb8   :  { %v254_v30 = vpop.permute.xlu1 %253  ;;  %v222_v31 = vpop.permute.xlu0 %221 }
  0xb9   :  { %v301_v32 = vsel %vm283_vm4, %v254_v30, %v222_v31  ;;  %v285_v33 = vsel %vm283_vm4, %v222_v31, %v254_v30  ;;  %v3655_v30 = vld [vmem:[%s4562_s1 + $0x60] sm:$0xff] }
  0xba   :  { %2592 = vmatprep.subr.msk.mxu0 %vm2877_vm5, %v301_v32  ;;  %v2902_v32 = vld [vmem:[#allocation2 + $0x10] ss:$8 sps:$4 sm:$0xff]  }
  0xbb   :  { %434 = vmatpush2.msra.mxu0 %v285_v33  ;;  %v3662_v33 = vld [vmem:[%s4562_s1 + $0x78] sm:$0xff] }
  0xbc   :  { %v153_v35 = vpop.permute.xlu1 %152  ;;  %v121_v36 = vpop.permute.xlu0 %120 }
  0xbd   :  { %v186_v37 = vsel %vm154_vm1, %v153_v35, %v121_v36  ;;  %v170_v38 = vsel %vm154_vm1, %v121_v36, %v153_v35  ;;  %v2907_v35 = vld [vmem:[#allocation2 + $0x4] ss:$8 sps:$4 sm:$0xff]  }
  0xbe   :  { %502 = vmatprep.subr.mxu1 %v170_v38 }
  0xbf   :  { %2604 = vmatpush1.msk.msra.mxu1 %vm2876_vm2, %v186_v37 }
  0xc0   :  { %v252_v39 = vpop.permute.xlu1 %251  ;;  %v220_v40 = vpop.permute.xlu0 %219 }
  0xc1   :  { %v300_v42 = vsel %vm283_vm4, %v252_v39, %v220_v40  ;;  %v284_v43 = vsel %vm283_vm4, %v220_v40, %v252_v39  ;;  %v3674_v39 = vld [vmem:[%s4562_s1 + $0x70] sm:$0xff] }
  0xc2   :  { %2594 = vmatprep.subr.msk.mxu0 %vm2877_vm5, %v300_v42  ;;  %v2910_v42 = vld [vmem:[#allocation2 + $0xf4] ss:$8 sps:$4 sm:$0xff]  }
  0xc3   :  { %436 = vmatpush2.msra.mxu0 %v284_v43 }
  0xc4   :  { %v151_v48 = vpop.permute.xlu1 %150  ;;  %v119_v49 = vpop.permute.xlu0 %118  ;;  %438 = vmatmul.mubr.f32.vlgmr.msra.gmra.mxu0 %v3543_v44  ;;  %819 = vmatprep.subr.bf16.mxu0 %v2886_v41  ;;  %v2905_v41 = vld [vmem:[#allocation2] ss:$8 sps:$4 sm:$0xff]  }
  0xc5   :  { %v185_v50 = vsel %vm154_vm1, %v151_v48, %v119_v49  ;;  %2596 = vmatprep.mubr.msk.f32.mxu0 %vm348_vm0, %v3550_v46  ;;  %v169_v52 = vsel %vm154_vm1, %v119_v49, %v151_v48  ;;  %820 = vmatpush1.bf16.msra.mxu0 %v2884_v45  ;;  %v2908_v49 = vld [vmem:[#allocation2 + $0xf0] ss:$8 sps:$4 sm:$0xff]  }
  0xc6   :  { %504 = vmatprep.subr.mxu1 %v169_v52  ;;  %821 = vmatprep.subr.bf16.mxu0 %v2889_v47 }
  0xc7   :  { %2606 = vmatpush1.msk.msra.mxu1 %vm2876_vm2, %v185_v50  ;;  %v2913_v50 = vld [vmem:[#allocation2 + $0xe4] ss:$8 sps:$4 sm:$0xff]  }
  0xc8   :  { %v149_v56 = vpop.permute.xlu1 %148  ;;  %v117_v57 = vpop.permute.xlu0 %116  ;;  %444 = vmatmul.mubr.f32.gmra.mxu0 %v3560_v51 }
  0xc9   :  { %v184_v58 = vsel %vm154_vm1, %v149_v56, %v117_v57  ;;  %2597 = vmatprep.mubr.msk.f32.mxu0 %vm348_vm0, %v3567_v54  ;;  %v168_v60 = vsel %vm154_vm1, %v117_v57, %v149_v56  ;;  %822 = vmatpush1.bf16.msra.mxu0 %v2887_v53  ;;  %v2911_v57 = vld [vmem:[#allocation2 + $0xe0] ss:$8 sps:$4 sm:$0xff]  }
  0xca   :  { %506 = vmatprep.subr.mxu1 %v168_v60  ;;  %823 = vmatprep.subr.bf16.mxu0 %v2892_v55 }
  0xcb   :  { %2608 = vmatpush1.msk.msra.mxu1 %vm2876_vm2, %v184_v58  ;;  %v2916_v58 = vld [vmem:[#allocation2 + $0xd4] ss:$8 sps:$4 sm:$0xff]  }
  0xcc   :  { %v147_v2 = vpop.permute.xlu1 %146  ;;  %v115_v3 = vpop.permute.xlu0 %114  ;;  %450 = vmatmul.mubr.f32.gmra.mxu0 %v3579_v59 }
  0xcd   :  { %v183_v4 = vsel %vm154_vm1, %v147_v2, %v115_v3  ;;  %2598 = vmatprep.mubr.msk.f32.mxu0 %vm348_vm0, %v3586_v62  ;;  %v167_v6 = vsel %vm154_vm1, %v115_v3, %v147_v2  ;;  %824 = vmatpush1.bf16.msra.mxu0 %v2890_v61  ;;  %v2914_v3 = vld [vmem:[#allocation2 + $0xd0] ss:$8 sps:$4 sm:$0xff]  }
  0xce   :  { %508 = vmatprep.subr.mxu1 %v167_v6  ;;  %825 = vmatprep.subr.bf16.mxu0 %v2895_v1 }
  0xcf   :  { %2610 = vmatpush1.msk.msra.mxu1 %vm2876_vm2, %v183_v4  ;;  %v2919_v4 = vld [vmem:[#allocation2 + $0xc4] ss:$8 sps:$4 sm:$0xff]  }
  0xd0   :  { %v145_v11 = vpop.permute.xlu1 %144  ;;  %v113_v12 = vpop.permute.xlu0 %112  ;;  %456 = vmatmul.mubr.f32.gmra.mxu0 %v3598_v5 }
  0xd1   :  { %v182_v13 = vsel %vm154_vm1, %v145_v11, %v113_v12  ;;  %2599 = vmatprep.mubr.msk.f32.mxu0 %vm348_vm0, %v3605_v9  ;;  %v166_v15 = vsel %vm154_vm1, %v113_v12, %v145_v11  ;;  %826 = vmatpush1.bf16.msra.mxu0 %v2893_v8  ;;  %v2917_v12 = vld [vmem:[#allocation2 + $0xc0] ss:$8 sps:$4 sm:$0xff]  }
  0xd2   :  { %510 = vmatprep.subr.mxu1 %v166_v15  ;;  %827 = vmatprep.subr.bf16.mxu0 %v2898_v10 }
  0xd3   :  { %2612 = vmatpush1.msk.msra.mxu1 %vm2876_vm2, %v182_v13  ;;  %v2922_v13 = vld [vmem:[#allocation2 + $0xb4] ss:$8 sps:$4 sm:$0xff]  }
  0xd4   :  { %v143_v19 = vpop.permute.xlu1 %142  ;;  %v111_v20 = vpop.permute.xlu0 %110  ;;  %462 = vmatmul.mubr.f32.gmra.mxu0 %v3617_v14 }
  0xd5   :  { %v181_v21 = vsel %vm154_vm1, %v143_v19, %v111_v20  ;;  %2600 = vmatprep.mubr.msk.f32.mxu0 %vm348_vm0, %v3624_v17  ;;  %v165_v23 = vsel %vm154_vm1, %v111_v20, %v143_v19  ;;  %828 = vmatpush1.bf16.msra.mxu0 %v2896_v16  ;;  %v2920_v20 = vld [vmem:[#allocation2 + $0xb0] ss:$8 sps:$4 sm:$0xff]  }
  0xd6   :  { %512 = vmatprep.subr.mxu1 %v165_v23  ;;  %829 = vmatprep.subr.bf16.mxu0 %v2901_v18 }
  0xd7   :  { %2614 = vmatpush1.msk.msra.mxu1 %vm2876_vm2, %v181_v21  ;;  %v2925_v21 = vld [vmem:[#allocation2 + $0xa4] ss:$8 sps:$4 sm:$0xff]  }
  0xd8   :  { %v141_v27 = vpop.permute.xlu1 %140  ;;  %v109_v28 = vpop.permute.xlu0 %108  ;;  %468 = vmatmul.mubr.f32.gmra.mxu0 %v3636_v22 }
  0xd9   :  { %v180_v29 = vsel %vm154_vm1, %v141_v27, %v109_v28  ;;  %2601 = vmatprep.mubr.msk.f32.mxu0 %vm348_vm0, %v3643_v25  ;;  %v164_v31 = vsel %vm154_vm1, %v109_v28, %v141_v27  ;;  %830 = vmatpush1.bf16.msra.mxu0 %v2899_v24  ;;  %v2923_v28 = vld [vmem:[#allocation2 + $0xa0] ss:$8 sps:$4 sm:$0xff]  }
  0xda   :  { %514 = vmatprep.subr.mxu1 %v164_v31  ;;  %831 = vmatprep.subr.bf16.mxu0 %v2904_v26 }
  0xdb   :  { %2616 = vmatpush1.msk.msra.mxu1 %vm2876_vm2, %v180_v29 }
  0xdc   :  { %v139_v36 = vpop.permute.xlu1 %138  ;;  %v107_v37 = vpop.permute.xlu0 %106  ;;  %474 = vmatmul.mubr.f32.gmra.mxu0 %v3655_v30 }
  0xdd   :  { %v179_v38 = vsel %vm154_vm1, %v139_v36, %v107_v37  ;;  %2602 = vmatprep.mubr.msk.f32.mxu0 %vm348_vm0, %v3662_v33  ;;  %v163_v40 = vsel %vm154_vm1, %v107_v37, %v139_v36  ;;  %832 = vmatpush1.bf16.msra.mxu0 %v2902_v32 }
  0xde   :  { %516 = vmatprep.subr.mxu1 %v163_v40  ;;  %833 = vmatprep.subr.bf16.mxu0 %v2907_v35 }
  0xdf   :  { %2618 = vmatpush1.msk.msra.mxu1 %vm2876_vm2, %v179_v38 }
  0xe0   :  { %v282_v43 = vpop.permute.xlu1 %281  ;;  %v250_v45 = vpop.permute.xlu0 %249  ;;  %480 = vmatmul.mubr.f32.gmra.mxu0 %v3674_v39  ;;  %2619 = vmatprep.subr.msk.mxu1 %vm72_vm3, %v3103_v7 }
  0xe1   :  { %v315_v47 = vsel %vm283_vm4, %v282_v43, %v250_v45  ;;  %2620 = vmatpush2.msk.msra.mxu1 %vm72_vm3, %v3103_v7  ;;  %v299_v48 = vsel %vm283_vm4, %v250_v45, %v282_v43  ;;  %834 = vmatpush1.bf16.msra.mxu0 %v2905_v41  ;;  %v2928_v41 = vld [vmem:[#allocation2 + $0x94] ss:$8 sps:$4 sm:$0xff]   ;;  %v2931_v43 = vld [vmem:[#allocation2 + $0x84] ss:$8 sps:$4 sm:$0xff]   ;;  %v2929_v45 = vld [vmem:[#allocation2 + $0x80] ss:$8 sps:$4 sm:$0xff]  }
  0xe2   :  { %2622 = vmatprep.subr.msk.mxu1 %vm2877_vm5, %v315_v47  ;;  %835 = vmatprep.subr.bf16.mxu0 %v2910_v42  ;;  %v2926_v42 = vld [vmem:[#allocation2 + $0x90] ss:$8 sps:$4 sm:$0xff]   ;;  %v2953_v47 = vld [vmem:[#allocation2 + $0x100] ss:$8 sps:$4 sm:$0xff]  }
  0xe3   :  { %535 = vmatpush2.msra.mxu1 %v299_v48  ;;  %v2958_v48 = vld [vmem:[#allocation2 + $0x1f4] ss:$8 sps:$4 sm:$0xff]  }
  0xe4   :  { %v280_v52 = vpop.permute.xlu1 %279  ;;  %v248_v53 = vpop.permute.xlu0 %247 }
  0xe5   :  { %v314_v55 = vsel %vm283_vm4, %v280_v52, %v248_v53  ;;  %v298_v56 = vsel %vm283_vm4, %v248_v53, %v280_v52  ;;  %836 = vmatpush2.bf16.msra.mxu0 %v2908_v49  ;;  %v2956_v49 = vld [vmem:[#allocation2 + $0x1f0] ss:$8 sps:$4 sm:$0xff]  }
  0xe6   :  { %2624 = vmatprep.subr.msk.mxu1 %vm2877_vm5, %v314_v55  ;;  %837 = vmatprep.subr.bf16.mxu0 %v2913_v50  ;;  %v2961_v50 = vld [vmem:[#allocation2 + $0x1e4] ss:$8 sps:$4 sm:$0xff]   ;;  %v2959_v55 = vld [vmem:[#allocation2 + $0x1e0] ss:$8 sps:$4 sm:$0xff]  }
  0xe7   :  { %537 = vmatpush2.msra.mxu1 %v298_v56  ;;  %v2964_v56 = vld [vmem:[#allocation2 + $0x1d4] ss:$8 sps:$4 sm:$0xff]  }
  0xe8   :  { %v278_v60 = vpop.permute.xlu1 %277  ;;  %v246_v61 = vpop.permute.xlu0 %245 }
  0xe9   :  { %v313_v1 = vsel %vm283_vm4, %v278_v60, %v246_v61  ;;  %v297_v2 = vsel %vm283_vm4, %v246_v61, %v278_v60  ;;  %838 = vmatpush2.bf16.msra.mxu0 %v2911_v57  ;;  %v2962_v60 = vld [vmem:[#allocation2 + $0x1d0] ss:$8 sps:$4 sm:$0xff]  }
  0xea   :  { %2626 = vmatprep.subr.msk.mxu1 %vm2877_vm5, %v313_v1  ;;  %839 = vmatprep.subr.bf16.mxu0 %v2916_v58  ;;  %v2967_v1 = vld [vmem:[#allocation2 + $0x1c4] ss:$8 sps:$4 sm:$0xff]  }
  0xeb   :  { %539 = vmatpush2.msra.mxu1 %v297_v2 }
  0xec   :  { %v276_v6 = vpop.permute.xlu1 %275  ;;  %v244_v8 = vpop.permute.xlu0 %243 }
  0xed   :  { %v312_v10 = vsel %vm283_vm4, %v276_v6, %v244_v8  ;;  %v296_v11 = vsel %vm283_vm4, %v244_v8, %v276_v6  ;;  %840 = vmatpush2.bf16.msra.mxu0 %v2914_v3  ;;  %v2965_v6 = vld [vmem:[#allocation2 + $0x1c0] ss:$8 sps:$4 sm:$0xff]   ;;  %v2970_v8 = vld [vmem:[#allocation2 + $0x1b4] ss:$8 sps:$4 sm:$0xff]  }
  0xee   :  { %2628 = vmatprep.subr.msk.mxu1 %vm2877_vm5, %v312_v10  ;;  %841 = vmatprep.subr.bf16.mxu0 %v2919_v4 }
  0xef   :  { %541 = vmatpush2.msra.mxu1 %v296_v11 }
  0xf0   :  { %v274_v15 = vpop.permute.xlu1 %273  ;;  %v242_v16 = vpop.permute.xlu0 %241 }
  0xf1   :  { %v311_v18 = vsel %vm283_vm4, %v274_v15, %v242_v16  ;;  %v295_v19 = vsel %vm283_vm4, %v242_v16, %v274_v15  ;;  %842 = vmatpush2.bf16.msra.mxu0 %v2917_v12 }
  0xf2   :  { %2630 = vmatprep.subr.msk.mxu1 %vm2877_vm5, %v311_v18  ;;  %843 = vmatprep.subr.bf16.mxu0 %v2922_v13  ;;  %v2968_v13 = vld [vmem:[#allocation2 + $0x1b0] ss:$8 sps:$4 sm:$0xff]  }
  0xf3   :  { %543 = vmatpush2.msra.mxu1 %v295_v19 }
  0xf4   :  { %v272_v23 = vpop.permute.xlu1 %271  ;;  %v240_v24 = vpop.permute.xlu0 %239 }
  0xf5   :  { %v310_v26 = vsel %vm283_vm4, %v272_v23, %v240_v24  ;;  %v294_v27 = vsel %vm283_vm4, %v240_v24, %v272_v23  ;;  %844 = vmatpush2.bf16.msra.mxu0 %v2920_v20 }
  0xf6   :  { %2632 = vmatprep.subr.msk.mxu1 %vm2877_vm5, %v310_v26  ;;  %845 = vmatprep.subr.bf16.mxu0 %v2925_v21 }
  0xf7   :  { %545 = vmatpush2.msra.mxu1 %v294_v27 }
  0xf8   :  { %v270_v29 = vpop.permute.xlu1 %269  ;;  %v238_v31 = vpop.permute.xlu0 %237 }
  0xf9   :  { %v309_v32 = vsel %vm283_vm4, %v270_v29, %v238_v31  ;;  %v293_v35 = vsel %vm283_vm4, %v238_v31, %v270_v29  ;;  %846 = vmatpush2.bf16.msra.mxu0 %v2923_v28 }
  0xfa   :  { %2634 = vmatprep.subr.msk.mxu1 %vm2877_vm5, %v309_v32  ;;  %847 = vmatprep.subr.bf16.mxu0 %v2928_v41 }
  0xfb   :  { %547 = vmatpush2.msra.mxu1 %v293_v35 }
  0xfc   :  { %v268_v36 = vpop.permute.xlu1 %267 }
  0xfd   :  { %v236_v37 = vpop.permute.xlu0 %235  ;;  %848 = vmatpush2.bf16.msra.mxu0 %v2926_v42 }
  0xfe   :  { %v308_v38 = vsel %vm283_vm4, %v268_v36, %v236_v37  ;;  %v292_v40 = vsel %vm283_vm4, %v236_v37, %v268_v36  ;;  %849 = vmatprep.subr.bf16.mxu0 %v2931_v43 }
  0xff   :  { %2636 = vmatprep.subr.msk.mxu1 %vm2877_vm5, %v308_v38 }
 0x100   :  { %549 = vmatpush2.msra.mxu1 %v292_v40 }
 0x101   :  { %551 = vmatmul.mubr.f32.vlgmr.msra.gmra.mxu1 %v3543_v44  ;;  %850 = vmatpush2.bf16.msra.mxu0 %v2929_v45  ;;  %v2932_v44 = vld [vmem:[#allocation2 + $0x170] ss:$8 sps:$4 sm:$0xff]   ;;  %v2973_v45 = vld [vmem:[#allocation2 + $0x1a4] ss:$8 sps:$4 sm:$0xff]  }
 0x102   :  { %2638 = vmatprep.mubr.msk.f32.mxu1 %vm348_vm0, %v3550_v46  ;;  %v2934_v46 = vld [vmem:[#allocation2 + $0x174] ss:$8 sps:$4 sm:$0xff]  }
 0x103   :  { %1154 = vmatprep.subr.bf16.mxu1 %v2934_v46 }
 0x104   :  { %1155 = vmatpush1.bf16.msra.mxu1 %v2932_v44  ;;  %v2971_v44 = vld [vmem:[#allocation2 + $0x1a0] ss:$8 sps:$4 sm:$0xff]  }
 0x105   :  { %557 = vmatmul.mubr.f32.gmra.mxu1 %v3560_v51  ;;  %v2937_v51 = vld [vmem:[#allocation2 + $0x164] ss:$8 sps:$4 sm:$0xff]  }
 0x106   :  { %2639 = vmatprep.mubr.msk.f32.mxu1 %vm348_vm0, %v3567_v54  ;;  %v2935_v54 = vld [vmem:[#allocation2 + $0x160] ss:$8 sps:$4 sm:$0xff]   ;;  %1156 = vmatprep.subr.bf16.mxu1 %v2937_v51 }
 0x108   :  { %1157 = vmatpush1.bf16.msra.mxu1 %v2935_v54 }
 0x109   :  { %563 = vmatmul.mubr.f32.gmra.mxu1 %v3579_v59  ;;  %v2940_v59 = vld [vmem:[#allocation2 + $0x154] ss:$8 sps:$4 sm:$0xff]  }
 0x10a   :  { %2640 = vmatprep.mubr.msk.f32.mxu1 %vm348_vm0, %v3586_v62  ;;  %v2938_v62 = vld [vmem:[#allocation2 + $0x150] ss:$8 sps:$4 sm:$0xff]   ;;  %1158 = vmatprep.subr.bf16.mxu1 %v2940_v59 }
 0x10c   :  { %1159 = vmatpush1.bf16.msra.mxu1 %v2938_v62  ;;  %v2976_v62 = vld [vmem:[#allocation2 + $0x194] ss:$8 sps:$4 sm:$0xff]  }
 0x10d   :  { %569 = vmatmul.mubr.f32.gmra.mxu1 %v3598_v5  ;;  %v2943_v5 = vld [vmem:[#allocation2 + $0x144] ss:$8 sps:$4 sm:$0xff]  }
 0x10e   :  { %2641 = vmatprep.mubr.msk.f32.mxu1 %vm348_vm0, %v3605_v9  ;;  %v2941_v9 = vld [vmem:[#allocation2 + $0x140] ss:$8 sps:$4 sm:$0xff]   ;;  %1160 = vmatprep.subr.bf16.mxu1 %v2943_v5  ;;  %v2974_v5 = vld [vmem:[#allocation2 + $0x190] ss:$8 sps:$4 sm:$0xff]  }
 0x110   :  { %1161 = vmatpush1.bf16.msra.mxu1 %v2941_v9 }
 0x111   :  { %575 = vmatmul.mubr.f32.gmra.mxu1 %v3617_v14  ;;  %v2946_v14 = vld [vmem:[#allocation2 + $0x134] ss:$8 sps:$4 sm:$0xff]  }
 0x112   :  { %2642 = vmatprep.mubr.msk.f32.mxu1 %vm348_vm0, %v3624_v17  ;;  %v2944_v17 = vld [vmem:[#allocation2 + $0x130] ss:$8 sps:$4 sm:$0xff]   ;;  %1162 = vmatprep.subr.bf16.mxu1 %v2946_v14 }
 0x114   :  { %1163 = vmatpush1.bf16.msra.mxu1 %v2944_v17  ;;  %v2979_v17 = vld [vmem:[#allocation2 + $0x184] ss:$8 sps:$4 sm:$0xff]  }
 0x115   :  { %581 = vmatmul.mubr.f32.gmra.mxu1 %v3636_v22  ;;  %v2949_v22 = vld [vmem:[#allocation2 + $0x124] ss:$8 sps:$4 sm:$0xff]  }
 0x116   :  { %2643 = vmatprep.mubr.msk.f32.mxu1 %vm348_vm0, %v3643_v25  ;;  %v2947_v25 = vld [vmem:[#allocation2 + $0x120] ss:$8 sps:$4 sm:$0xff]   ;;  %1164 = vmatprep.subr.bf16.mxu1 %v2949_v22 }
 0x117   :  { %v2977_v22 = vld [vmem:[#allocation2 + $0x180] ss:$8 sps:$4 sm:$0xff]  }
 0x118   :  { %1165 = vmatpush1.bf16.msra.mxu1 %v2947_v25 }
 0x119   :  { %587 = vmatmul.mubr.f32.gmra.mxu1 %v3655_v30  ;;  %v2952_v30 = vld [vmem:[#allocation2 + $0x114] ss:$8 sps:$4 sm:$0xff]  }
 0x11a   :  { %2644 = vmatprep.mubr.msk.f32.mxu1 %vm348_vm0, %v3662_v33  ;;  %v2950_v33 = vld [vmem:[#allocation2 + $0x110] ss:$8 sps:$4 sm:$0xff]   ;;  %1166 = vmatprep.subr.bf16.mxu1 %v2952_v30 }
 0x11c   :  { %1167 = vmatpush1.bf16.msra.mxu1 %v2950_v33 }
 0x11d   :  { %593 = vmatmul.mubr.f32.gmra.mxu1 %v3674_v39  ;;  %v2955_v39 = vld [vmem:[#allocation2 + $0x104] ss:$8 sps:$4 sm:$0xff]  }
 0x11e   :  { %1168 = vmatprep.subr.bf16.mxu1 %v2955_v39 }
 0x120   :  { %1169 = vmatpush1.bf16.msra.mxu1 %v2953_v47 }
 0x121   :  { %1170 = vmatprep.subr.bf16.mxu1 %v2958_v48 }
 0x124   :  { %1171 = vmatpush2.bf16.msra.mxu1 %v2956_v49 }
 0x125   :  { %1172 = vmatprep.subr.bf16.mxu1 %v2961_v50 }
 0x128   :  { %1173 = vmatpush2.bf16.msra.mxu1 %v2959_v55  ;;  %v3761_v55 = vsub.s32 0, %v3466_v63 }
 0x129   :  { %1174 = vmatprep.subr.bf16.mxu1 %v2964_v56 }
 0x12c   :  { %1175 = vmatpush2.bf16.msra.mxu1 %v2962_v60 }
 0x12d   :  { %1176 = vmatprep.subr.bf16.mxu1 %v2967_v1 }
 0x130   :  { %1177 = vmatpush2.bf16.msra.mxu1 %v2965_v6 }
 0x131   :  { %1178 = vmatprep.subr.bf16.mxu1 %v2970_v8 }
 0x134   :  { %1179 = vmatpush2.bf16.msra.mxu1 %v2968_v13 }
 0x135   :  { %1180 = vmatprep.subr.bf16.mxu1 %v2973_v45 }
 0x138   :  { %1181 = vmatpush2.bf16.msra.mxu1 %v2971_v44 }
 0x139   :  { %1182 = vmatprep.subr.bf16.mxu1 %v2976_v62 }
 0x13c   :  { %1183 = vmatpush2.bf16.msra.mxu1 %v2974_v5 }
 0x13d   :  { %1184 = vmatprep.subr.bf16.mxu1 %v2979_v17 }
 0x140   :  { %1185 = vmatpush2.bf16.msra.mxu1 %v2977_v22 }
 0x184   :  { %v439_v52 = vpop.f32.mrf.mxu0 }
 0x186   :  { %v441_v53 = vpop.f32.mrf.mxu0 }
 0x188   :  { %v445_v57 = vpop.f32.mrf.mxu0 }
 0x189   :  { %v599_v2 = vpack.c.bf16 %v445_v57, %v439_v52  ;;  %v647_v57 = vld [vmem:[%s4564_s3] sm:$0x3] }
 0x18a   :  { %v447_v58 = vpop.f32.mrf.mxu0 }
 0x18b   :  { %v600_v61 = vpack.c.bf16 %v447_v58, %v441_v53  ;;  %v3758_v53 = vsub.s32 1, %v3466_v63  ;;  %v4301_v63 = vld [vmem:[%s4562_s1 + $0xe0] sm:$0xff] }
 0x18c   :  { %v451_v3 = vpop.f32.mrf.mxu0 }
 0x18d   :  { %851 = vmatprep.mubr.bf16.mxu0 %v600_v61  ;;  %v3767_v60 = vrot.slane %v647_v57, %v3758_v53  ;;  %v3770_v61 = vrot.slane %v647_v57, %v3761_v55 }
 0x18e   :  { %v453_v4 = vpop.f32.mrf.mxu0  ;;  %852 = vmatmul.mubr.bf16.vlgmr.msra.gmra.mxu0 %v599_v2 }
 0x190   :  { %v457_v10 = vpop.f32.mrf.mxu0 }
 0x191   :  { %v601_v11 = vpack.c.bf16 %v457_v10, %v451_v3 }
 0x192   :  { %v459_v12 = vpop.f32.mrf.mxu0 }
 0x193   :  { %v602_v15 = vpack.c.bf16 %v459_v12, %v453_v4 }
 0x194   :  { %v463_v16 = vpop.f32.mrf.mxu0 }
 0x195   :  { %861 = vmatprep.mubr.bf16.mxu0 %v602_v15 }
 0x196   :  { %v465_v18 = vpop.f32.mrf.mxu0  ;;  %862 = vmatmul.mubr.bf16.gmra.mxu0 %v601_v11 }
 0x198   :  { %v469_v19 = vpop.f32.mrf.mxu0 }
 0x199   :  { %v603_v20 = vpack.c.bf16 %v469_v19, %v463_v16 }
 0x19a   :  { %v471_v21 = vpop.f32.mrf.mxu0 }
 0x19b   :  { %v604_v23 = vpack.c.bf16 %v471_v21, %v465_v18 }
 0x19c   :  { %v475_v24 = vpop.f32.mrf.mxu0 }
 0x19d   :  { %871 = vmatprep.mubr.bf16.mxu0 %v604_v23 }
 0x19e   :  { %v477_v26 = vpop.f32.mrf.mxu0  ;;  %872 = vmatmul.mubr.bf16.gmra.mxu0 %v603_v20 }
 0x1a0   :  { %v481_v27 = vpop.f32.mrf.mxu0 }
 0x1a1   :  { %v605_v28 = vpack.c.bf16 %v481_v27, %v475_v24 }
 0x1a2   :  { %v483_v29 = vpop.f32.mrf.mxu0 }
 0x1a3   :  { %v606_v31 = vpack.c.bf16 %v483_v29, %v477_v26 }
 0x1a5   :  { %881 = vmatprep.mubr.bf16.mxu0 %v606_v31 }
 0x1a6   :  { %882 = vmatmul.mubr.bf16.gmra.mxu0 %v605_v28 }
 0x1c1   :  { %v552_v32 = vpop.f32.mrf.mxu1 }
 0x1c3   :  { %v554_v35 = vpop.f32.mrf.mxu1 }
 0x1c5   :  { %v558_v36 = vpop.f32.mrf.mxu1 }
 0x1c6   :  { %v607_v40 = vpack.c.bf16 %v558_v36, %v552_v32 }
 0x1c7   :  { %v560_v37 = vpop.f32.mrf.mxu1 }
 0x1c8   :  { %v608_v38 = vpack.c.bf16 %v560_v37, %v554_v35 }
 0x1c9   :  { %v564_v41 = vpop.f32.mrf.mxu1 }
 0x1ca   :  { %891 = vmatprep.mubr.bf16.mxu0 %v608_v38 }
 0x1cb   :  { %v566_v42 = vpop.f32.mrf.mxu1  ;;  %892 = vmatmul.mubr.bf16.gmra.mxu0 %v607_v40 }
 0x1cd   :  { %v570_v43 = vpop.f32.mrf.mxu1 }
 0x1ce   :  { %v609_v54 = vpack.c.bf16 %v570_v43, %v564_v41 }
 0x1cf   :  { %v572_v46 = vpop.f32.mrf.mxu1 }
 0x1d0   :  { %v610_v51 = vpack.c.bf16 %v572_v46, %v566_v42 }
 0x1d1   :  { %v576_v59 = vpop.f32.mrf.mxu1 }
 0x1d2   :  { %901 = vmatprep.mubr.bf16.mxu0 %v610_v51 }
 0x1d3   :  { %v578_v9 = vpop.f32.mrf.mxu1  ;;  %902 = vmatmul.mubr.bf16.gmra.mxu0 %v609_v54 }
 0x1d5   :  { %v582_v14 = vpop.f32.mrf.mxu1 }
 0x1d6   :  { %v611_v33 = vpack.c.bf16 %v582_v14, %v576_v59 }
 0x1d7   :  { %v584_v25 = vpop.f32.mrf.mxu1 }
 0x1d8   :  { %v612_v30 = vpack.c.bf16 %v584_v25, %v578_v9 }
 0x1d9   :  { %v588_v39 = vpop.f32.mrf.mxu1 }
 0x1da   :  { %911 = vmatprep.mubr.bf16.mxu0 %v612_v30 }
 0x1db   :  { %v590_v47 = vpop.f32.mrf.mxu1  ;;  %912 = vmatmul.mubr.bf16.gmra.mxu0 %v611_v33 }
 0x1dd   :  { %v594_v48 = vpop.f32.mrf.mxu1 }
 0x1de   :  { %v613_v52 = vpack.c.bf16 %v594_v48, %v588_v39 }
 0x1df   :  { %v596_v49 = vpop.f32.mrf.mxu1 }
 0x1e0   :  { %v614_v50 = vpack.c.bf16 %v596_v49, %v590_v47 }
 0x1e2   :  { %921 = vmatprep.mubr.bf16.mxu0 %v614_v50 }
 0x1e3   :  { %922 = vmatmul.mubr.bf16.gmra.mxu0 %v613_v52 }
 0x24e   :  { %v853_v56 = vpop.f32.mrf.mxu0 }
 0x24f   :  { %v854_v8 = vadd.f32 %v853_v56, %v3770_v61 }
 0x250   :  { %v855_v58 = vpop.f32.mrf.mxu0 }
 0x251   :  { %v856_v4 = vadd.f32 %v855_v58, %v3767_v60 }
 0x252   :  { %v857_v1 = vpop.f32.mrf.mxu0 }
 0x253   :  { %v858_v2 = vadd.f32 %v857_v1, %v3770_v61 }
 0x254   :  { %v859_v3 = vpop.f32.mrf.mxu0 }
 0x255   :  { %v860_v6 = vadd.f32 %v859_v3, %v3767_v60  ;;  %v932_v12 = vpack.c.bf16 %v858_v2, %v854_v8 }
 0x256   :  { %v863_v10 = vpop.f32.mrf.mxu0 }
 0x257   :  { %v933_v11 = vpack.c.bf16 %v860_v6, %v856_v4  ;;  %v864_v21 = vadd.f32 %v863_v10, %v3770_v61 }
 0x258   :  { %v865_v13 = vpop.f32.mrf.mxu0 }
 0x259   :  { %1186 = vmatprep.mubr.bf16.mxu1 %v933_v11  ;;  %v866_v19 = vadd.f32 %v865_v13, %v3767_v60 }
 0x25a   :  { %v867_v15 = vpop.f32.mrf.mxu0  ;;  %1187 = vmatmul.mubr.bf16.vlgmr.msra.gmra.mxu1 %v932_v12 }
 0x25b   :  { %v868_v16 = vadd.f32 %v867_v15, %v3770_v61 }
 0x25c   :  { %v869_v18 = vpop.f32.mrf.mxu0 }
 0x25d   :  { %v870_v20 = vadd.f32 %v869_v18, %v3767_v60  ;;  %v934_v26 = vpack.c.bf16 %v868_v16, %v864_v21 }
 0x25e   :  { %v873_v23 = vpop.f32.mrf.mxu0 }
 0x25f   :  { %v935_v24 = vpack.c.bf16 %v870_v20, %v866_v19  ;;  %v874_v28 = vadd.f32 %v873_v23, %v3770_v61 }
 0x260   :  { %v875_v27 = vpop.f32.mrf.mxu0 }
 0x261   :  { %1196 = vmatprep.mubr.bf16.mxu1 %v935_v24  ;;  %v876_v31 = vadd.f32 %v875_v27, %v3767_v60 }
 0x262   :  { %v877_v29 = vpop.f32.mrf.mxu0  ;;  %1197 = vmatmul.mubr.bf16.gmra.mxu1 %v934_v26 }
 0x263   :  { %v878_v32 = vadd.f32 %v877_v29, %v3770_v61 }
 0x264   :  { %v879_v35 = vpop.f32.mrf.mxu0 }
 0x265   :  { %v880_v36 = vadd.f32 %v879_v35, %v3767_v60  ;;  %v936_v37 = vpack.c.bf16 %v878_v32, %v874_v28 }
 0x266   :  { %v883_v38 = vpop.f32.mrf.mxu0 }
 0x267   :  { %v937_v40 = vpack.c.bf16 %v880_v36, %v876_v31  ;;  %v884_v42 = vadd.f32 %v883_v38, %v3770_v61  ;;  %v2677_v31 = vld [vmem:[%s4564_s3 + $0x2] sm:$0x3] }
 0x268   :  { %v885_v41 = vpop.f32.mrf.mxu0  ;;  %v3808_v32 = vrot.slane %v2677_v31, %v3761_v55  ;;  %v3811_v35 = vrot.slane %v2677_v31, %v3758_v53 }
 0x269   :  { %1206 = vmatprep.mubr.bf16.mxu1 %v937_v40  ;;  %v886_v45 = vadd.f32 %v885_v41, %v3767_v60 }
 0x26a   :  { %v887_v43 = vpop.f32.mrf.mxu0  ;;  %1207 = vmatmul.mubr.bf16.gmra.mxu1 %v936_v37 }
 0x26b   :  { %v888_v44 = vadd.f32 %v887_v43, %v3770_v61 }
 0x26c   :  { %v889_v46 = vpop.f32.mrf.mxu0 }
 0x26d   :  { %v890_v51 = vadd.f32 %v889_v46, %v3767_v60  ;;  %v938_v54 = vpack.c.bf16 %v888_v44, %v884_v42 }
 0x26f   :  { %v939_v59 = vpack.c.bf16 %v890_v51, %v886_v45 }
 0x271   :  { %1216 = vmatprep.mubr.bf16.mxu1 %v939_v59 }
 0x272   :  { %1217 = vmatmul.mubr.bf16.gmra.mxu1 %v938_v54 }
 0x28b   :  { %v893_v62 = vpop.f32.mrf.mxu0 }
 0x28c   :  { %v894_v30 = vadd.f32 %v893_v62, %v3770_v61 }
 0x28d   :  { %v895_v5 = vpop.f32.mrf.mxu0 }
 0x28e   :  { %v896_v22 = vadd.f32 %v895_v5, %v3767_v60 }
 0x28f   :  { %v897_v9 = vpop.f32.mrf.mxu0 }
 0x290   :  { %v898_v14 = vadd.f32 %v897_v9, %v3770_v61 }
 0x291   :  { %v899_v17 = vpop.f32.mrf.mxu0 }
 0x292   :  { %v900_v25 = vadd.f32 %v899_v17, %v3767_v60  ;;  %v940_v47 = vpack.c.bf16 %v898_v14, %v894_v30 }
 0x293   :  { %v903_v33 = vpop.f32.mrf.mxu0 }
 0x294   :  { %v941_v39 = vpack.c.bf16 %v900_v25, %v896_v22  ;;  %v904_v58 = vadd.f32 %v903_v33, %v3770_v61 }
 0x295   :  { %v905_v48 = vpop.f32.mrf.mxu0 }
 0x296   :  { %1226 = vmatprep.mubr.bf16.mxu1 %v941_v39  ;;  %v906_v56 = vadd.f32 %v905_v48, %v3767_v60 }
 0x297   :  { %v907_v49 = vpop.f32.mrf.mxu0  ;;  %1227 = vmatmul.mubr.bf16.gmra.mxu1 %v940_v47 }
 0x298   :  { %v908_v50 = vadd.f32 %v907_v49, %v3770_v61 }
 0x299   :  { %v909_v52 = vpop.f32.mrf.mxu0 }
 0x29a   :  { %v910_v57 = vadd.f32 %v909_v52, %v3767_v60  ;;  %v942_v3 = vpack.c.bf16 %v908_v50, %v904_v58 }
 0x29b   :  { %v913_v1 = vpop.f32.mrf.mxu0 }
 0x29c   :  { %v943_v2 = vpack.c.bf16 %v910_v57, %v906_v56  ;;  %v914_v13 = vadd.f32 %v913_v1, %v3770_v61 }
 0x29d   :  { %v915_v4 = vpop.f32.mrf.mxu0 }
 0x29e   :  { %1236 = vmatprep.mubr.bf16.mxu1 %v943_v2  ;;  %v916_v11 = vadd.f32 %v915_v4, %v3767_v60 }
 0x29f   :  { %v917_v6 = vpop.f32.mrf.mxu0  ;;  %1237 = vmatmul.mubr.bf16.gmra.mxu1 %v942_v3 }
 0x2a0   :  { %v918_v8 = vadd.f32 %v917_v6, %v3770_v61 }
 0x2a1   :  { %v919_v10 = vpop.f32.mrf.mxu0 }
 0x2a2   :  { %v920_v12 = vadd.f32 %v919_v10, %v3767_v60  ;;  %v944_v18 = vpack.c.bf16 %v918_v8, %v914_v13 }
 0x2a3   :  { %v923_v15 = vpop.f32.mrf.mxu0 }
 0x2a4   :  { %v945_v16 = vpack.c.bf16 %v920_v12, %v916_v11  ;;  %v924_v27 = vadd.f32 %v923_v15, %v3770_v61 }
 0x2a5   :  { %v925_v19 = vpop.f32.mrf.mxu0 }
 0x2a6   :  { %1246 = vmatprep.mubr.bf16.mxu1 %v945_v16  ;;  %v926_v24 = vadd.f32 %v925_v19, %v3767_v60 }
 0x2a7   :  { %v927_v20 = vpop.f32.mrf.mxu0  ;;  %1247 = vmatmul.mubr.bf16.gmra.mxu1 %v944_v18 }
 0x2a8   :  { %v928_v21 = vadd.f32 %v927_v20, %v3770_v61 }
 0x2a9   :  { %v929_v23 = vpop.f32.mrf.mxu0 }
 0x2aa   :  { %v930_v26 = vadd.f32 %v929_v23, %v3767_v60  ;;  %v946_v29 = vpack.c.bf16 %v928_v21, %v924_v27 }
 0x2ac   :  { %v947_v28 = vpack.c.bf16 %v930_v26, %v926_v24 }
 0x2ae   :  { %1256 = vmatprep.mubr.bf16.mxu1 %v947_v28 }
 0x2af   :  { %1257 = vmatmul.mubr.bf16.gmra.mxu1 %v946_v29 }
 0x31a   :  { %v1188_v36 = vpop.f32.mrf.mxu1 }
 0x31b   :  { %v1189_v37 = vadd.f32 %v1188_v36, %v3808_v32 }
 0x31c   :  { %v1190_v60 = vpop.f32.mrf.mxu1 }
 0x31d   :  { %v3814_v38 = vmax.f32 %v1189_v37, 0.0  ;;  %v1191_v61 = vadd.f32 %v1190_v60, %v3811_v35 }
 0x31e   :  { %v1192_v40 = vpop.f32.mrf.mxu1 }
 0x31f   :  { %v3817_v41 = vmax.f32 %v1191_v61, 0.0  ;;  %1316 = vrot.lane.b32.xlu0 %v3814_v38, %s3101_s26  ;;  %v1193_v43 = vadd.f32 %v1192_v40, %v3808_v32 }
 0x320   :  { %v1194_v42 = vpop.f32.mrf.mxu1 }
 0x321   :  { %1348 = vrot.lane.b32.xlu1 %v3817_v41, %s3101_s26  ;;  %v1195_v44 = vadd.f32 %v1194_v42, %v3811_v35  ;;  %v3827_v51 = vmax.f32 %v1193_v43, 0.0 }
 0x322   :  { %v1198_v45 = vpop.f32.mrf.mxu1 }
 0x323   :  { %1444 = vrot.lane.b32.xlu0 %v3814_v38, %s3102_s8  ;;  %v3831_v59 = vmax.f32 %v1195_v44, 0.0  ;;  %v1199_v5 = vadd.f32 %v1198_v45, %v3808_v32 }
 0x324   :  { %v1200_v46 = vpop.f32.mrf.mxu1 }
 0x325   :  { %1476 = vrot.lane.b32.xlu1 %v3817_v41, %s3102_s8  ;;  %v1201_v14 = vadd.f32 %v1200_v46, %v3811_v35  ;;  %v1271_v22 = vmax.f32 %v1199_v5, 0.0 }
 0x326   :  { %v1202_v54 = vpop.f32.mrf.mxu1 }
 0x327   :  { %1318 = vrot.lane.b32.xlu0 %v3827_v51, %s3101_s26  ;;  %v1272_v30 = vmax.f32 %v1201_v14, 0.0  ;;  %v1203_v39 = vadd.f32 %v1202_v54, %v3808_v32 }
 0x328   :  { %v1204_v62 = vpop.f32.mrf.mxu1 }
 0x329   :  { %1350 = vrot.lane.b32.xlu1 %v3831_v59, %s3101_s26  ;;  %v1205_v48 = vadd.f32 %v1204_v62, %v3811_v35  ;;  %v1273_v50 = vmax.f32 %v1203_v39, 0.0  ;;  %v2711_v39 = vld [vmem:[%s4562_s1 + $0x88] sm:$0xff] }
 0x32a   :  { %v1208_v9 = vpop.f32.mrf.mxu1  ;;  %2760 = vmatprep.mubr.msk.f32.mxu0 %vm348_vm0, %v2711_v39  ;;  %2802 = vmatprep.mubr.msk.f32.mxu1 %vm348_vm0, %v2711_v39 }
 0x32b   :  { %1446 = vrot.lane.b32.xlu0 %v3827_v51, %s3102_s8  ;;  %v1274_v56 = vmax.f32 %v1205_v48, 0.0  ;;  %v1209_v3 = vadd.f32 %v1208_v9, %v3808_v32 }
 0x32c   :  { %v1210_v17 = vpop.f32.mrf.mxu1 }
 0x32d   :  { %1478 = vrot.lane.b32.xlu1 %v3831_v59, %s3102_s8  ;;  %v1211_v8 = vadd.f32 %v1210_v17, %v3811_v35  ;;  %v1275_v16 = vmax.f32 %v1209_v3, 0.0 }
 0x32e   :  { %v1212_v25 = vpop.f32.mrf.mxu1 }
 0x32f   :  { %1320 = vrot.lane.b32.xlu0 %v1271_v22, %s3101_s26  ;;  %v1213_v13 = vadd.f32 %v1212_v25, %v3808_v32  ;;  %v1276_v18 = vmax.f32 %v1211_v8, 0.0 }
 0x330   :  { %v1214_v33 = vpop.f32.mrf.mxu1 }
 0x331   :  { %1352 = vrot.lane.b32.xlu1 %v1272_v30, %s3101_s26  ;;  %v1215_v10 = vadd.f32 %v1214_v33, %v3811_v35  ;;  %v1277_v20 = vmax.f32 %v1213_v13, 0.0 }
 0x332   :  { %v1218_v47 = vpop.f32.mrf.mxu1 }
 0x333   :  { %1448 = vrot.lane.b32.xlu0 %v1271_v22, %s3102_s8  ;;  %v1219_v1 = vadd.f32 %v1218_v47, %v3808_v32  ;;  %v1278_v19 = vmax.f32 %v1215_v10, 0.0 }
 0x334   :  { %v1220_v49 = vpop.f32.mrf.mxu1 }
 0x335   :  { %1480 = vrot.lane.b32.xlu1 %v1272_v30, %s3102_s8  ;;  %v1221_v57 = vadd.f32 %v1220_v49, %v3811_v35  ;;  %v1279_v15 = vmax.f32 %v1219_v1, 0.0 }
 0x336   :  { %v1222_v52 = vpop.f32.mrf.mxu1 }
 0x337   :  { %v1223_v58 = vadd.f32 %v1222_v52, %v3808_v32  ;;  %1322 = vrot.lane.b32.xlu0 %v1273_v50, %s3101_s26  ;;  %v1280_v11 = vmax.f32 %v1221_v57, 0.0 }
 0x338   :  { %v1224_v2 = vpop.f32.mrf.mxu1 }
 0x339   :  { %v1225_v4 = vadd.f32 %v1224_v2, %v3811_v35  ;;  %1354 = vrot.lane.b32.xlu1 %v1274_v56, %s3101_s26  ;;  %v1281_v6 = vmax.f32 %v1223_v58, 0.0 }
 0x33b   :  { %v1282_v12 = vmax.f32 %v1225_v4, 0.0  ;;  %1450 = vrot.lane.b32.xlu0 %v1273_v50, %s3102_s8 }
 0x33d   :  { %1482 = vrot.lane.b32.xlu1 %v1274_v56, %s3102_s8  ;;  %1596 = vmatprep.subr.mxu0 %v1282_v12 }
 0x33e   :  { %1597 = vmatpush1.msra.mxu0 %v1281_v6 }
 0x33f   :  { %1324 = vrot.lane.b32.xlu0 %v1275_v16, %s3101_s26  ;;  %1598 = vmatprep.subr.mxu0 %v1280_v11 }
 0x340   :  { %1599 = vmatpush1.msra.mxu0 %v1279_v15 }
 0x341   :  { %1356 = vrot.lane.b32.xlu1 %v1276_v18, %s3101_s26  ;;  %1600 = vmatprep.subr.mxu0 %v1278_v19 }
 0x342   :  { %1601 = vmatpush1.msra.mxu0 %v1277_v20 }
 0x343   :  { %1452 = vrot.lane.b32.xlu0 %v1275_v16, %s3102_s8  ;;  %1602 = vmatprep.subr.mxu0 %v1276_v18 }
 0x344   :  { %1603 = vmatpush1.msra.mxu0 %v1275_v16 }
 0x345   :  { %1484 = vrot.lane.b32.xlu1 %v1276_v18, %s3102_s8  ;;  %1604 = vmatprep.subr.mxu0 %v1274_v56 }
 0x346   :  { %1605 = vmatpush1.msra.mxu0 %v1273_v50 }
 0x347   :  { %1326 = vrot.lane.b32.xlu0 %v1277_v20, %s3101_s26  ;;  %1606 = vmatprep.subr.mxu0 %v1272_v30 }
 0x348   :  { %1607 = vmatpush1.msra.mxu0 %v1271_v22 }
 0x349   :  { %1358 = vrot.lane.b32.xlu1 %v1278_v19, %s3101_s26  ;;  %1608 = vmatprep.subr.mxu0 %v3831_v59 }
 0x34a   :  { %1609 = vmatpush1.msra.mxu0 %v3827_v51 }
 0x34b   :  { %1454 = vrot.lane.b32.xlu0 %v1277_v20, %s3102_s8  ;;  %1610 = vmatprep.subr.mxu0 %v3817_v41 }
 0x34c   :  { %1611 = vmatpush1.msra.mxu0 %v3814_v38 }
 0x34d   :  { %1486 = vrot.lane.b32.xlu1 %v1278_v19, %s3102_s8 }
 0x34f   :  { %1328 = vrot.lane.b32.xlu0 %v1279_v15, %s3101_s26 }
 0x351   :  { %1360 = vrot.lane.b32.xlu1 %v1280_v11, %s3101_s26 }
 0x353   :  { %1456 = vrot.lane.b32.xlu0 %v1279_v15, %s3102_s8 }
 0x355   :  { %1488 = vrot.lane.b32.xlu1 %v1280_v11, %s3102_s8 }
 0x357   :  { %v1228_v21 = vpop.f32.mrf.mxu1  ;;  %1330 = vrot.lane.b32.xlu0 %v1281_v6, %s3101_s26 }
 0x358   :  { %v1229_v23 = vadd.f32 %v1228_v21, %v3808_v32 }
 0x359   :  { %v1230_v24 = vpop.f32.mrf.mxu1  ;;  %1362 = vrot.lane.b32.xlu1 %v1282_v12, %s3101_s26 }
 0x35a   :  { %v1231_v26 = vadd.f32 %v1230_v24, %v3811_v35  ;;  %v3882_v28 = vmax.f32 %v1229_v23, 0.0 }
 0x35b   :  { %v1232_v27 = vpop.f32.mrf.mxu1  ;;  %1458 = vrot.lane.b32.xlu0 %v1281_v6, %s3102_s8 }
 0x35c   :  { %v1233_v29 = vadd.f32 %v1232_v27, %v3808_v32  ;;  %v3886_v36 = vmax.f32 %v1231_v26, 0.0 }
 0x35d   :  { %v1234_v31 = vpop.f32.mrf.mxu1  ;;  %1490 = vrot.lane.b32.xlu1 %v1282_v12, %s3102_s8 }
 0x35e   :  { %v1235_v37 = vadd.f32 %v1234_v31, %v3811_v35  ;;  %v3891_v38 = vmax.f32 %v1233_v29, 0.0 }
 0x35f   :  { %v1238_v60 = vpop.f32.mrf.mxu1  ;;  %1332 = vrot.lane.b32.xlu0 %v3882_v28, %s3101_s26 }
 0x360   :  { %v1239_v61 = vadd.f32 %v1238_v60, %v3808_v32  ;;  %v3896_v41 = vmax.f32 %v1235_v37, 0.0 }
 0x361   :  { %v1240_v40 = vpop.f32.mrf.mxu1  ;;  %1364 = vrot.lane.b32.xlu1 %v3886_v36, %s3101_s26 }
 0x362   :  { %v1241_v42 = vadd.f32 %v1240_v40, %v3811_v35  ;;  %v3901_v45 = vmax.f32 %v1239_v61, 0.0 }
 0x363   :  { %v1242_v43 = vpop.f32.mrf.mxu1  ;;  %1334 = vrot.lane.b32.xlu0 %v3891_v38, %s3101_s26 }
 0x364   :  { %v1243_v44 = vadd.f32 %v1242_v43, %v3808_v32  ;;  %v3906_v51 = vmax.f32 %v1241_v42, 0.0 }
 0x365   :  { %v1244_v46 = vpop.f32.mrf.mxu1  ;;  %1366 = vrot.lane.b32.xlu1 %v3896_v41, %s3101_s26 }
 0x366   :  { %v1245_v54 = vadd.f32 %v1244_v46, %v3811_v35  ;;  %v1289_v62 = vmax.f32 %v1243_v44, 0.0 }
 0x367   :  { %v1248_v59 = vpop.f32.mrf.mxu1  ;;  %1336 = vrot.lane.b32.xlu0 %v3901_v45, %s3101_s26 }
 0x368   :  { %v1249_v5 = vadd.f32 %v1248_v59, %v3808_v32  ;;  %v1290_v14 = vmax.f32 %v1245_v54, 0.0 }
 0x369   :  { %v1250_v9 = vpop.f32.mrf.mxu1  ;;  %1368 = vrot.lane.b32.xlu1 %v3906_v51, %s3101_s26 }
 0x36a   :  { %v1251_v17 = vadd.f32 %v1250_v9, %v3811_v35  ;;  %v1291_v25 = vmax.f32 %v1249_v5, 0.0 }
 0x36b   :  { %v1252_v22 = vpop.f32.mrf.mxu1  ;;  %1338 = vrot.lane.b32.xlu0 %v1289_v62, %s3101_s26 }
 0x36c   :  { %v1253_v30 = vadd.f32 %v1252_v22, %v3808_v32  ;;  %v1292_v47 = vmax.f32 %v1251_v17, 0.0 }
 0x36d   :  { %v1254_v33 = vpop.f32.mrf.mxu1  ;;  %1370 = vrot.lane.b32.xlu1 %v1290_v14, %s3101_s26 }
 0x36e   :  { %v1255_v48 = vadd.f32 %v1254_v33, %v3811_v35  ;;  %v1293_v50 = vmax.f32 %v1253_v30, 0.0 }
 0x36f   :  { %v1258_v49 = vpop.f32.mrf.mxu1  ;;  %1340 = vrot.lane.b32.xlu0 %v1291_v25, %s3101_s26 }
 0x370   :  { %v1259_v52 = vadd.f32 %v1258_v49, %v3808_v32  ;;  %v1294_v57 = vmax.f32 %v1255_v48, 0.0 }
 0x371   :  { %v1260_v56 = vpop.f32.mrf.mxu1  ;;  %1372 = vrot.lane.b32.xlu1 %v1292_v47, %s3101_s26 }
 0x372   :  { %v1261_v58 = vadd.f32 %v1260_v56, %v3811_v35  ;;  %v1295_v2 = vmax.f32 %v1259_v52, 0.0 }
 0x373   :  { %v1262_v1 = vpop.f32.mrf.mxu1  ;;  %1342 = vrot.lane.b32.xlu0 %v1293_v50, %s3101_s26 }
 0x374   :  { %v1263_v3 = vadd.f32 %v1262_v1, %v3808_v32  ;;  %v1296_v8 = vmax.f32 %v1261_v58, 0.0 }
 0x375   :  { %v1264_v4 = vpop.f32.mrf.mxu1  ;;  %1374 = vrot.lane.b32.xlu1 %v1294_v57, %s3101_s26 }
 0x376   :  { %v1265_v6 = vadd.f32 %v1264_v4, %v3811_v35  ;;  %v1297_v11 = vmax.f32 %v1263_v3, 0.0 }
 0x377   :  { %1344 = vrot.lane.b32.xlu0 %v1295_v2, %s3101_s26 }
 0x378   :  { %v1298_v10 = vmax.f32 %v1265_v6, 0.0 }
 0x379   :  { %1376 = vrot.lane.b32.xlu1 %v1296_v8, %s3101_s26 }
 0x37a   :  { %1709 = vmatprep.subr.mxu1 %v1298_v10 }
 0x37b   :  { %1710 = vmatpush1.msra.mxu1 %v1297_v11  ;;  %1346 = vrot.lane.b32.xlu0 %v1297_v11, %s3101_s26 }
 0x37c   :  { %1711 = vmatprep.subr.mxu1 %v1296_v8 }
 0x37d   :  { %1712 = vmatpush1.msra.mxu1 %v1295_v2  ;;  %1378 = vrot.lane.b32.xlu1 %v1298_v10, %s3101_s26 }
 0x37e   :  { %1713 = vmatprep.subr.mxu1 %v1294_v57 }
 0x37f   :  { %1714 = vmatpush1.msra.mxu1 %v1293_v50  ;;  %1472 = vrot.lane.b32.xlu0 %v1295_v2, %s3102_s8 }
 0x380   :  { %1715 = vmatprep.subr.mxu1 %v1292_v47 }
 0x381   :  { %1716 = vmatpush1.msra.mxu1 %v1291_v25  ;;  %1504 = vrot.lane.b32.xlu1 %v1296_v8, %s3102_s8 }
 0x382   :  { %1717 = vmatprep.subr.mxu1 %v1290_v14 }
 0x383   :  { %1718 = vmatpush1.msra.mxu1 %v1289_v62  ;;  %1474 = vrot.lane.b32.xlu0 %v1297_v11, %s3102_s8 }
 0x384   :  { %1719 = vmatprep.subr.mxu1 %v3906_v51 }
 0x385   :  { %1720 = vmatpush1.msra.mxu1 %v3901_v45  ;;  %1502 = vrot.lane.b32.xlu1 %v1294_v57, %s3102_s8 }
 0x386   :  { %1721 = vmatprep.subr.mxu1 %v3896_v41 }
 0x387   :  { %1722 = vmatpush1.msra.mxu1 %v3891_v38  ;;  %1470 = vrot.lane.b32.xlu0 %v1293_v50, %s3102_s8 }
 0x388   :  { %1723 = vmatprep.subr.mxu1 %v3886_v36 }
 0x389   :  { %1724 = vmatpush1.msra.mxu1 %v3882_v28  ;;  %1500 = vrot.lane.b32.xlu1 %v1292_v47, %s3102_s8 }
 0x38b   :  { %1468 = vrot.lane.b32.xlu0 %v1291_v25, %s3102_s8 }
 0x38d   :  { %1506 = vrot.lane.b32.xlu1 %v1298_v10, %s3102_s8 }
 0x38f   :  { %1466 = vrot.lane.b32.xlu0 %v1289_v62, %s3102_s8 }
 0x391   :  { %v1317_v32 = vpop.permute.xlu0 %1316  ;;  %1498 = vrot.lane.b32.xlu1 %v1290_v14, %s3102_s8 }
 0x393   :  { %v1349_v35 = vpop.permute.xlu1 %1348  ;;  %1464 = vrot.lane.b32.xlu0 %v3901_v45, %s3102_s8 }
 0x394   :  { %v3956_v12 = vsel %vm154_vm1, %v1349_v35, %v1317_v32  ;;  %v3960_v13 = vsel %vm154_vm1, %v1317_v32, %v1349_v35 }
 0x395   :  { %v1445_v15 = vpop.permute.xlu0 %1444  ;;  %1496 = vrot.lane.b32.xlu1 %v3906_v51, %s3102_s8 }
 0x397   :  { %v1477_v16 = vpop.permute.xlu1 %1476  ;;  %1462 = vrot.lane.b32.xlu0 %v3891_v38, %s3102_s8 }
 0x398   :  { %v3968_v18 = vsel %vm283_vm4, %v1445_v15, %v1477_v16  ;;  %v3972_v19 = vsel %vm283_vm4, %v1477_v16, %v1445_v15 }
 0x399   :  { %v3974_v20 = vpop.permute.xlu0 %1318  ;;  %1494 = vrot.lane.b32.xlu1 %v3896_v41, %s3102_s8 }
 0x39b   :  { %v3978_v21 = vpop.permute.xlu1 %1350  ;;  %1460 = vrot.lane.b32.xlu0 %v3882_v28, %s3102_s8 }
 0x39c   :  { %v1381_v10 = vsel %vm154_vm1, %v3974_v20, %v3978_v21  ;;  %v1397_v11 = vsel %vm154_vm1, %v3978_v21, %v3974_v20 }
 0x39d   :  { %v1447_v23 = vpop.permute.xlu0 %1446  ;;  %1492 = vrot.lane.b32.xlu1 %v3886_v36, %s3102_s8 }
 0x39f   :  { %v1479_v24 = vpop.permute.xlu1 %1478 }
 0x3a0   :  { %v3986_v26 = vsel %vm283_vm4, %v1447_v23, %v1479_v24  ;;  %v3990_v27 = vsel %vm283_vm4, %v1479_v24, %v1447_v23 }
 0x3a1   :  { %v1321_v29 = vpop.permute.xlu0 %1320 }
 0x3a3   :  { %v1353_v31 = vpop.permute.xlu1 %1352 }
 0x3a4   :  { %v1382_v4 = vsel %vm154_vm1, %v1321_v29, %v1353_v31  ;;  %v1398_v6 = vsel %vm154_vm1, %v1353_v31, %v1321_v29 }
 0x3a5   :  { %v1449_v37 = vpop.permute.xlu0 %1448 }
 0x3a7   :  { %v1481_v60 = vpop.permute.xlu1 %1480 }
 0x3a8   :  { %v3994_v28 = vsel %vm283_vm4, %v1449_v37, %v1481_v60  ;;  %v3998_v36 = vsel %vm283_vm4, %v1481_v60, %v1449_v37 }
 0x3a9   :  { %v1323_v38 = vpop.permute.xlu0 %1322 }
 0x3ab   :  { %v1355_v61 = vpop.permute.xlu1 %1354 }
 0x3ac   :  { %v1383_v1 = vsel %vm154_vm1, %v1323_v38, %v1355_v61  ;;  %v1399_v2 = vsel %vm154_vm1, %v1355_v61, %v1323_v38 }
 0x3ad   :  { %v4000_v40 = vpop.permute.xlu0 %1450 }
 0x3af   :  { %v4002_v41 = vpop.permute.xlu1 %1482 }
 0x3b0   :  { %v1527_v61 = vsel %vm283_vm4, %v4002_v41, %v4000_v40 }
 0x3b1   :  { %v1325_v42 = vpop.permute.xlu0 %1324 }
 0x3b3   :  { %v1357_v43 = vpop.permute.xlu1 %1356 }
 0x3b4   :  { %v1384_v56 = vsel %vm154_vm1, %v1325_v42, %v1357_v43  ;;  %v1400_v57 = vsel %vm154_vm1, %v1357_v43, %v1325_v42  ;;  %v1511_v42 = vsel %vm283_vm4, %v4000_v40, %v4002_v41  ;;  %v4131_v40 = vld [vmem:[%s4562_s1 + $0x80] sm:$0xff]  ;;  %v2980_v41 = vld [vmem:[#allocation2 + $0x270] ss:$8 sps:$4 sm:$0xff]  }
 0x3b5   :  { %v4004_v45 = vpop.permute.xlu0 %1452 }
 0x3b7   :  { %v4006_v44 = vpop.permute.xlu1 %1484 }
 0x3b8   :  { %v1528_v37 = vsel %vm283_vm4, %v4006_v44, %v4004_v45  ;;  %v1512_v60 = vsel %vm283_vm4, %v4004_v45, %v4006_v44 }
 0x3b9   :  { %v1327_v46 = vpop.permute.xlu0 %1326 }
 0x3bb   :  { %v1359_v51 = vpop.permute.xlu1 %1358 }
 0x3bc   :  { %v1385_v49 = vsel %vm154_vm1, %v1327_v46, %v1359_v51  ;;  %v1401_v50 = vsel %vm154_vm1, %v1359_v51, %v1327_v46  ;;  %v2982_v46 = vld [vmem:[#allocation2 + $0x274] ss:$8 sps:$4 sm:$0xff]  }
 0x3bd   :  { %v1455_v54 = vpop.permute.xlu0 %1454 }
 0x3bf   :  { %v1487_v59 = vpop.permute.xlu1 %1486 }
 0x3c0   :  { %v1529_v24 = vsel %vm283_vm4, %v1487_v59, %v1455_v54  ;;  %v1513_v29 = vsel %vm283_vm4, %v1455_v54, %v1487_v59  ;;  %v4159_v59 = vld [vmem:[%s4562_s1 + $0xa8] sm:$0xff] }
 0x3c1   :  { %v1329_v62 = vpop.permute.xlu0 %1328 }
 0x3c3   :  { %v1361_v5 = vpop.permute.xlu1 %1360 }
 0x3c4   :  { %v1386_v39 = vsel %vm154_vm1, %v1329_v62, %v1361_v5  ;;  %v1402_v47 = vsel %vm154_vm1, %v1361_v5, %v1329_v62  ;;  %v2983_v62 = vld [vmem:[#allocation2 + $0x260] ss:$8 sps:$4 sm:$0xff]  }
 0x3c5   :  { %v1457_v9 = vpop.permute.xlu0 %1456 }
 0x3c7   :  { %v1489_v14 = vpop.permute.xlu1 %1488 }
 0x3c8   :  { %v1514_v21 = vsel %vm283_vm4, %v1457_v9, %v1489_v14 }
 0x3c9   :  { %v1331_v17 = vpop.permute.xlu0 %1330 }
 0x3cb   :  { %v1363_v22 = vpop.permute.xlu1 %1362 }
 0x3cc   :  { %v1403_v25 = vsel %vm154_vm1, %v1363_v22, %v1331_v17  ;;  %v1387_v30 = vsel %vm154_vm1, %v1331_v17, %v1363_v22 }
 0x3cd   :  { %v1459_v33 = vpop.permute.xlu0 %1458  ;;  %1612 = vmatprep.subr.mxu0 %v1387_v30 }
 0x3ce   :  { %2727 = vmatpush1.msk.msra.mxu0 %vm2876_vm2, %v1403_v25  ;;  %v4179_v25 = vld [vmem:[%s4562_s1 + $0xa0] sm:$0xff] }
 0x3cf   :  { %v1491_v48 = vpop.permute.xlu1 %1490  ;;  %1614 = vmatprep.subr.mxu0 %v1386_v39  ;;  %v4186_v39 = vld [vmem:[%s4562_s1 + $0xb8] sm:$0xff] }
 0x3d0   :  { %2729 = vmatpush1.msk.msra.mxu0 %vm2876_vm2, %v1402_v47  ;;  %v1531_v16 = vsel %vm283_vm4, %v1491_v48, %v1459_v33  ;;  %v2986_v47 = vld [vmem:[#allocation2 + $0x250] ss:$8 sps:$4 sm:$0xff]  }
 0x3d1   :  { %v4024_v52 = vpop.permute.xlu0 %1332  ;;  %1616 = vmatprep.subr.mxu0 %v1385_v49  ;;  %v2991_v49 = vld [vmem:[#allocation2 + $0x244] ss:$8 sps:$4 sm:$0xff]  }
 0x3d2   :  { %2731 = vmatpush1.msk.msra.mxu0 %vm2876_vm2, %v1401_v50 }
 0x3d3   :  { %v4032_v58 = vpop.permute.xlu1 %1364  ;;  %1618 = vmatprep.subr.mxu0 %v1384_v56 }
 0x3d4   :  { %2733 = vmatpush1.msk.msra.mxu0 %vm2876_vm2, %v1400_v57 }
 0x3d5   :  { %v4040_v3 = vpop.permute.xlu0 %1334  ;;  %1620 = vmatprep.subr.mxu0 %v1383_v1  ;;  %v4210_v1 = vld [vmem:[%s4562_s1 + $0xb0] sm:$0xff] }
 0x3d6   :  { %2735 = vmatpush1.msk.msra.mxu0 %vm2876_vm2, %v1399_v2 }
 0x3d7   :  { %v4048_v8 = vpop.permute.xlu1 %1366  ;;  %1622 = vmatprep.subr.mxu0 %v1382_v4 }
 0x3d8   :  { %2737 = vmatpush1.msk.msra.mxu0 %vm2876_vm2, %v1398_v6  ;;  %v4219_v6 = vld [vmem:[%s4562_s1 + $0xc8] sm:$0xff] }
 0x3d9   :  { %v4060_v32 = vpop.permute.xlu0 %1336  ;;  %1624 = vmatprep.subr.mxu0 %v1381_v10  ;;  %v2989_v10 = vld [vmem:[#allocation2 + $0x240] ss:$8 sps:$4 sm:$0xff]  }
 0x3da   :  { %2739 = vmatpush1.msk.msra.mxu0 %vm2876_vm2, %v1397_v11 }
 0x3db   :  { %v4064_v35 = vpop.permute.xlu1 %1368  ;;  %1626 = vmatprep.subr.mxu0 %v3960_v13  ;;  %v1515_v13 = vsel %vm283_vm4, %v1459_v33, %v1491_v48 }
 0x3dc   :  { %2741 = vmatpush1.msk.msra.mxu0 %vm2876_vm2, %v3956_v12  ;;  %v1530_v12 = vsel %vm283_vm4, %v1489_v14, %v1457_v9  ;;  %v2988_v9 = vld [vmem:[#allocation2 + $0x254] ss:$8 sps:$4 sm:$0xff]   ;;  %v1390_v11 = vsel %vm154_vm1, %v4060_v32, %v4064_v35 }
 0x3dd   :  { %v4070_v15 = vpop.permute.xlu0 %1338  ;;  %2742 = vmatprep.subr.msk.mxu0 %vm72_vm3, %v3103_v7 }
 0x3de   :  { %2743 = vmatpush2.msk.msra.mxu0 %vm72_vm3, %v3103_v7 }
 0x3df   :  { %v4082_v20 = vpop.permute.xlu1 %1370  ;;  %2745 = vmatprep.subr.msk.mxu0 %vm2877_vm5, %v1531_v16  ;;  %v2994_v16 = vld [vmem:[#allocation2 + $0x234] ss:$8 sps:$4 sm:$0xff]  }
 0x3e0   :  { %1645 = vmatpush2.msra.mxu0 %v1515_v13  ;;  %v1391_v57 = vsel %vm154_vm1, %v4070_v15, %v4082_v20  ;;  %v1407_v2 = vsel %vm154_vm1, %v4082_v20, %v4070_v15  ;;  %v1406_v15 = vsel %vm154_vm1, %v4064_v35, %v4060_v32  ;;  %v1389_v20 = vsel %vm154_vm1, %v4040_v3, %v4048_v8 }
 0x3e1   :  { %v4090_v23 = vpop.permute.xlu0 %1340  ;;  %2747 = vmatprep.subr.msk.mxu0 %vm2877_vm5, %v1530_v12  ;;  %v4243_v12 = vld [vmem:[%s4562_s1 + $0xc0] sm:$0xff]  ;;  %v1405_v32 = vsel %vm154_vm1, %v4048_v8, %v4040_v3  ;;  %v1404_v3 = vsel %vm154_vm1, %v4032_v58, %v4024_v52 }
 0x3e2   :  { %1647 = vmatpush2.msra.mxu0 %v1514_v21  ;;  %v4252_v21 = vld [vmem:[%s4562_s1 + $0xd8] sm:$0xff] }
 0x3e3   :  { %v1373_v31 = vpop.permute.xlu1 %1372  ;;  %2749 = vmatprep.subr.msk.mxu0 %vm2877_vm5, %v1529_v24  ;;  %v1388_v24 = vsel %vm154_vm1, %v4024_v52, %v4032_v58  ;;  %v4280_v58 = vld [vmem:[%s4562_s1 + $0xe8] sm:$0xff] }
 0x3e4   :  { %1649 = vmatpush2.msra.mxu0 %v1513_v29  ;;  %v1392_v48 = vsel %vm154_vm1, %v4090_v23, %v1373_v31  ;;  %v1408_v50 = vsel %vm154_vm1, %v1373_v31, %v4090_v23  ;;  %v2992_v23 = vld [vmem:[#allocation2 + $0x230] ss:$8 sps:$4 sm:$0xff]   ;;  %v2997_v29 = vld [vmem:[#allocation2 + $0x224] ss:$8 sps:$4 sm:$0xff]  }
 0x3e5   :  { %v1343_v38 = vpop.permute.xlu0 %1342  ;;  %2751 = vmatprep.subr.msk.mxu0 %vm2877_vm5, %v1528_v37  ;;  %v4272_v31 = vld [vmem:[%s4562_s1 + $0xd0] sm:$0xff]  ;;  %v2995_v37 = vld [vmem:[#allocation2 + $0x220] ss:$8 sps:$4 sm:$0xff]  }
 0x3e6   :  { %1651 = vmatpush2.msra.mxu0 %v1512_v60 }
 0x3e7   :  { %v1375_v43 = vpop.permute.xlu1 %1374  ;;  %2753 = vmatprep.subr.msk.mxu0 %vm2877_vm5, %v1527_v61 }
 0x3e8   :  { %1653 = vmatpush2.msra.mxu0 %v1511_v42  ;;  %v1393_v22 = vsel %vm154_vm1, %v1343_v38, %v1375_v43  ;;  %v1409_v30 = vsel %vm154_vm1, %v1375_v43, %v1343_v38  ;;  %v3000_v38 = vld [vmem:[#allocation2 + $0x214] ss:$8 sps:$4 sm:$0xff]  }
 0x3e9   :  { %v1345_v45 = vpop.permute.xlu0 %1344  ;;  %2755 = vmatprep.subr.msk.mxu0 %vm2877_vm5, %v3998_v36 }
 0x3ea   :  { %1655 = vmatpush2.msra.mxu0 %v3994_v28  ;;  %v4139_v28 = vld [vmem:[%s4562_s1 + $0x98] sm:$0xff] }
 0x3eb   :  { %v1377_v44 = vpop.permute.xlu1 %1376  ;;  %2757 = vmatprep.subr.msk.mxu0 %vm2877_vm5, %v3990_v27  ;;  %v2985_v27 = vld [vmem:[#allocation2 + $0x264] ss:$8 sps:$4 sm:$0xff]  }
 0x3ec   :  { %1657 = vmatpush2.msra.mxu0 %v3986_v26  ;;  %v1394_v5 = vsel %vm154_vm1, %v1345_v45, %v1377_v44  ;;  %v1410_v14 = vsel %vm154_vm1, %v1377_v44, %v1345_v45  ;;  %v4312_v44 = vld [vmem:[%s4562_s1 + $0xf8] sm:$0xff] }
 0x3ed   :  { %v1347_v51 = vpop.permute.xlu0 %1346  ;;  %2759 = vmatprep.subr.msk.mxu0 %vm2877_vm5, %v3972_v19  ;;  %v4152_v19 = vld [vmem:[%s4562_s1 + $0x90] sm:$0xff] }
 0x3ee   :  { %1659 = vmatpush2.msra.mxu0 %v3968_v18 }
 0x3ef   :  { %v1379_v26 = vpop.permute.xlu1 %1378  ;;  %1661 = vmatmul.mubr.f32.vlgmr.msra.gmra.mxu0 %v4131_v40  ;;  %2044 = vmatprep.subr.bf16.mxu0 %v2982_v46  ;;  %v2998_v46 = vld [vmem:[#allocation2 + $0x210] ss:$8 sps:$4 sm:$0xff]  }
 0x3f0   :  { %v1411_v36 = vsel %vm154_vm1, %v1379_v26, %v1347_v51  ;;  %v1395_v54 = vsel %vm154_vm1, %v1347_v51, %v1379_v26  ;;  %2761 = vmatprep.mubr.msk.f32.mxu0 %vm348_vm0, %v4139_v28  ;;  %2045 = vmatpush1.bf16.msra.mxu0 %v2980_v41  ;;  %v3003_v51 = vld [vmem:[#allocation2 + $0x204] ss:$8 sps:$4 sm:$0xff]  }
 0x3f1   :  { %1725 = vmatprep.subr.mxu1 %v1395_v54  ;;  %v4154_v18 = vpop.permute.xlu0 %1472  ;;  %2046 = vmatprep.subr.bf16.mxu0 %v2985_v27  ;;  %v4330_v54 = vld [vmem:[%s4562_s1 + $0xf0] sm:$0xff] }
 0x3f2   :  { %2769 = vmatpush1.msk.msra.mxu1 %vm2876_vm2, %v1411_v36 }
 0x3f3   :  { %v4167_v17 = vpop.permute.xlu1 %1504  ;;  %1667 = vmatmul.mubr.f32.gmra.mxu0 %v4152_v19  ;;  %1727 = vmatprep.subr.mxu1 %v1394_v5  ;;  %v3001_v5 = vld [vmem:[#allocation2 + $0x200] ss:$8 sps:$4 sm:$0xff]  }
 0x3f4   :  { %2771 = vmatpush1.msk.msra.mxu1 %vm2876_vm2, %v1410_v14  ;;  %2762 = vmatprep.mubr.msk.f32.mxu0 %vm348_vm0, %v4159_v59  ;;  %v1538_v43 = vsel %vm283_vm4, %v4167_v17, %v4154_v18  ;;  %v3006_v14 = vld [vmem:[#allocation2 + $0x2f4] ss:$8 sps:$4 sm:$0xff]  }
 0x3f5   :  { %1729 = vmatprep.subr.mxu1 %v1393_v22  ;;  %v1475_v33 = vpop.permute.xlu0 %1474  ;;  %2047 = vmatpush1.bf16.msra.mxu0 %v2983_v62 }
 0x3f6   :  { %2773 = vmatpush1.msk.msra.mxu1 %vm2876_vm2, %v1409_v30  ;;  %2048 = vmatprep.subr.bf16.mxu0 %v2988_v9 }
 0x3f7   :  { %v4196_v56 = vpop.permute.xlu1 %1502  ;;  %1673 = vmatmul.mubr.f32.gmra.mxu0 %v4179_v25  ;;  %1731 = vmatprep.subr.mxu1 %v1392_v48 }
 0x3f8   :  { %2775 = vmatpush1.msk.msra.mxu1 %vm2876_vm2, %v1408_v50  ;;  %2763 = vmatprep.mubr.msk.f32.mxu0 %vm348_vm0, %v4186_v39 }
 0x3f9   :  { %1733 = vmatprep.subr.mxu1 %v1391_v57  ;;  %v1471_v4 = vpop.permute.xlu0 %1470  ;;  %2049 = vmatpush1.bf16.msra.mxu0 %v2986_v47  ;;  %v3004_v47 = vld [vmem:[#allocation2 + $0x2f0] ss:$8 sps:$4 sm:$0xff]  }
 0x3fa   :  { %2777 = vmatpush1.msk.msra.mxu1 %vm2876_vm2, %v1407_v2  ;;  %2050 = vmatprep.subr.bf16.mxu0 %v2991_v49  ;;  %v1537_v41 = vsel %vm283_vm4, %v4196_v56, %v1471_v4  ;;  %v1521_v27 = vsel %vm283_vm4, %v1471_v4, %v4196_v56  ;;  %v3009_v49 = vld [vmem:[#allocation2 + $0x2e4] ss:$8 sps:$4 sm:$0xff]  }
 0x3fb   :  { %v1501_v13 = vpop.permute.xlu1 %1500  ;;  %1679 = vmatmul.mubr.f32.gmra.mxu0 %v4210_v1  ;;  %1735 = vmatprep.subr.mxu1 %v1390_v11  ;;  %v3012_v11 = vld [vmem:[#allocation2 + $0x2d4] ss:$8 sps:$4 sm:$0xff]  }
 0x3fc   :  { %2779 = vmatpush1.msk.msra.mxu1 %vm2876_vm2, %v1406_v15  ;;  %2764 = vmatprep.mubr.msk.f32.mxu0 %vm348_vm0, %v4219_v6  ;;  %v3015_v15 = vld [vmem:[#allocation2 + $0x2c4] ss:$8 sps:$4 sm:$0xff]  }
 0x3fd   :  { %1737 = vmatprep.subr.mxu1 %v1389_v20  ;;  %v1469_v35 = vpop.permute.xlu0 %1468  ;;  %2051 = vmatpush1.bf16.msra.mxu0 %v2989_v10  ;;  %v3007_v10 = vld [vmem:[#allocation2 + $0x2e0] ss:$8 sps:$4 sm:$0xff]   ;;  %v3033_v20 = vld [vmem:[#allocation2 + $0x364] ss:$8 sps:$4 sm:$0xff]  }
 0x3fe   :  { %2781 = vmatpush1.msk.msra.mxu1 %vm2876_vm2, %v1405_v32  ;;  %2052 = vmatprep.subr.bf16.mxu0 %v2994_v16  ;;  %v1536_v36 = vsel %vm283_vm4, %v1501_v13, %v1469_v35  ;;  %v3010_v16 = vld [vmem:[#allocation2 + $0x2d0] ss:$8 sps:$4 sm:$0xff]   ;;  %v3036_v32 = vld [vmem:[#allocation2 + $0x354] ss:$8 sps:$4 sm:$0xff]  }
 0x3ff   :  { %v1507_v8 = vpop.permute.xlu1 %1506  ;;  %1685 = vmatmul.mubr.f32.gmra.mxu0 %v4243_v12  ;;  %1739 = vmatprep.subr.mxu1 %v1388_v24  ;;  %v3042_v24 = vld [vmem:[#allocation2 + $0x334] ss:$8 sps:$4 sm:$0xff]  }
 0x400   :  { %2783 = vmatpush1.msk.msra.mxu1 %vm2876_vm2, %v1404_v3  ;;  %2765 = vmatprep.mubr.msk.f32.mxu0 %vm348_vm0, %v4252_v21  ;;  %v1539_v60 = vsel %vm283_vm4, %v1507_v8, %v1475_v33  ;;  %v1523_v61 = vsel %vm283_vm4, %v1475_v33, %v1507_v8  ;;  %v3045_v3 = vld [vmem:[#allocation2 + $0x324] ss:$8 sps:$4 sm:$0xff]   ;;  %v3043_v8 = vld [vmem:[#allocation2 + $0x320] ss:$8 sps:$4 sm:$0xff]  }
 0x401   :  { %2784 = vmatprep.subr.msk.mxu1 %vm72_vm3, %v3103_v7  ;;  %v1467_v52 = vpop.permute.xlu0 %1466  ;;  %2053 = vmatpush1.bf16.msra.mxu0 %v2992_v23  ;;  %v3037_v23 = vld [vmem:[#allocation2 + $0x340] ss:$8 sps:$4 sm:$0xff]  }
 0x402   :  { %2785 = vmatpush2.msk.msra.mxu1 %vm72_vm3, %v3103_v7  ;;  %2054 = vmatprep.subr.bf16.mxu0 %v2997_v29  ;;  %v1522_v7 = vsel %vm283_vm4, %v4154_v18, %v4167_v17  ;;  %v1520_v18 = vsel %vm283_vm4, %v1469_v35, %v1501_v13  ;;  %v3030_v13 = vld [vmem:[#allocation2 + $0x374] ss:$8 sps:$4 sm:$0xff]   ;;  %v3034_v35 = vld [vmem:[#allocation2 + $0x350] ss:$8 sps:$4 sm:$0xff]  }
 0x403   :  { %v1499_v42 = vpop.permute.xlu1 %1498  ;;  %1691 = vmatmul.mubr.f32.gmra.mxu0 %v4272_v31  ;;  %2787 = vmatprep.subr.msk.mxu1 %vm2877_vm5, %v1539_v60  ;;  %v3040_v29 = vld [vmem:[#allocation2 + $0x330] ss:$8 sps:$4 sm:$0xff]   ;;  %v3054_v60 = vld [vmem:[#allocation2 + $0x3f4] ss:$8 sps:$4 sm:$0xff]  }
 0x404   :  { %1758 = vmatpush2.msra.mxu1 %v1523_v61  ;;  %2766 = vmatprep.mubr.msk.f32.mxu0 %vm348_vm0, %v4280_v58  ;;  %v1535_v9 = vsel %vm283_vm4, %v1499_v42, %v1467_v52  ;;  %v1519_v17 = vsel %vm283_vm4, %v1467_v52, %v1499_v42  ;;  %v3046_v52 = vld [vmem:[#allocation2 + $0x310] ss:$8 sps:$4 sm:$0xff]   ;;  %v3057_v61 = vld [vmem:[#allocation2 + $0x3e4] ss:$8 sps:$4 sm:$0xff]   ;;  %v3055_v42 = vld [vmem:[#allocation2 + $0x3e0] ss:$8 sps:$4 sm:$0xff]  }
 0x405   :  { %2789 = vmatprep.subr.msk.mxu1 %vm2877_vm5, %v1538_v43  ;;  %v1465_v45 = vpop.permute.xlu0 %1464  ;;  %2055 = vmatpush1.bf16.msra.mxu0 %v2995_v37  ;;  %v3049_v37 = vld [vmem:[#allocation2 + $0x300] ss:$8 sps:$4 sm:$0xff]   ;;  %v3060_v43 = vld [vmem:[#allocation2 + $0x3d4] ss:$8 sps:$4 sm:$0xff]  }
 0x406   :  { %1760 = vmatpush2.msra.mxu1 %v1522_v7  ;;  %2056 = vmatprep.subr.bf16.mxu0 %v3000_v38  ;;  %v3052_v38 = vld [vmem:[#allocation2 + $0x3f0] ss:$8 sps:$4 sm:$0xff]   ;;  %v3063_v7 = vld [vmem:[#allocation2 + $0x3c4] ss:$8 sps:$4 sm:$0xff]  }
 0x407   :  { %v1497_v26 = vpop.permute.xlu1 %1496  ;;  %1697 = vmatmul.mubr.f32.gmra.mxu0 %v4301_v63  ;;  %2791 = vmatprep.subr.msk.mxu1 %vm2877_vm5, %v1537_v41 }
 0x408   :  { %1762 = vmatpush2.msra.mxu1 %v1521_v27  ;;  %2767 = vmatprep.mubr.msk.f32.mxu0 %vm348_vm0, %v4312_v44  ;;  %v1534_v30 = vsel %vm283_vm4, %v1497_v26, %v1465_v45  ;;  %v1518_v33 = vsel %vm283_vm4, %v1465_v45, %v1497_v26  ;;  %v3061_v45 = vld [vmem:[#allocation2 + $0x3c0] ss:$8 sps:$4 sm:$0xff]  }
 0x409   :  { %2793 = vmatprep.subr.msk.mxu1 %vm2877_vm5, %v1536_v36  ;;  %v1463_v62 = vpop.permute.xlu0 %1462  ;;  %2057 = vmatpush1.bf16.msra.mxu0 %v2998_v46  ;;  %v3064_v46 = vld [vmem:[#allocation2 + $0x3b0] ss:$8 sps:$4 sm:$0xff]  }
 0x40a   :  { %1764 = vmatpush2.msra.mxu1 %v1520_v18  ;;  %2058 = vmatprep.subr.bf16.mxu0 %v3003_v51 }
 0x40b   :  { %v1495_v22 = vpop.permute.xlu1 %1494  ;;  %1703 = vmatmul.mubr.f32.gmra.mxu0 %v4330_v54  ;;  %2795 = vmatprep.subr.msk.mxu1 %vm2877_vm5, %v1535_v9 }
 0x40c   :  { %1766 = vmatpush2.msra.mxu1 %v1519_v17  ;;  %v1533_v48 = vsel %vm283_vm4, %v1495_v22, %v1463_v62  ;;  %v1517_v50 = vsel %vm283_vm4, %v1463_v62, %v1495_v22 }
 0x40d   :  { %2797 = vmatprep.subr.msk.mxu1 %vm2877_vm5, %v1534_v30  ;;  %2059 = vmatpush1.bf16.msra.mxu0 %v3001_v5  ;;  %v1461_v56 = vpop.permute.xlu0 %1460 }
 0x40e   :  { %1768 = vmatpush2.msra.mxu1 %v1518_v33  ;;  %2060 = vmatprep.subr.bf16.mxu0 %v3006_v14 }
 0x40f   :  { %v1493_v57 = vpop.permute.xlu1 %1492  ;;  %2799 = vmatprep.subr.msk.mxu1 %vm2877_vm5, %v1533_v48 }
 0x410   :  { %v1516_v2 = vsel %vm283_vm4, %v1461_v56, %v1493_v57  ;;  %v1532_v4 = vsel %vm283_vm4, %v1493_v57, %v1461_v56  ;;  %1770 = vmatpush2.msra.mxu1 %v1517_v50 }
 0x411   :  { %2801 = vmatprep.subr.msk.mxu1 %vm2877_vm5, %v1532_v4  ;;  %2061 = vmatpush2.bf16.msra.mxu0 %v3004_v47 }
 0x412   :  { %1772 = vmatpush2.msra.mxu1 %v1516_v2  ;;  %2062 = vmatprep.subr.bf16.mxu0 %v3009_v49 }
 0x413   :  { %1774 = vmatmul.mubr.f32.vlgmr.msra.gmra.mxu1 %v4131_v40  ;;  %v3016_v40 = vld [vmem:[#allocation2 + $0x2b0] ss:$8 sps:$4 sm:$0xff]   ;;  %2379 = vmatprep.subr.bf16.mxu1 %v3030_v13 }
 0x414   :  { %2803 = vmatprep.mubr.msk.f32.mxu1 %vm348_vm0, %v4139_v28  ;;  %v3021_v28 = vld [vmem:[#allocation2 + $0x2a4] ss:$8 sps:$4 sm:$0xff]  }
 0x415   :  { %2063 = vmatpush2.bf16.msra.mxu0 %v3007_v10 }
 0x416   :  { %2064 = vmatprep.subr.bf16.mxu0 %v3012_v11 }
 0x417   :  { %1780 = vmatmul.mubr.f32.gmra.mxu1 %v4152_v19  ;;  %v3019_v19 = vld [vmem:[#allocation2 + $0x2a0] ss:$8 sps:$4 sm:$0xff]  }
 0x418   :  { %2804 = vmatprep.mubr.msk.f32.mxu1 %vm348_vm0, %v4159_v59  ;;  %v3024_v59 = vld [vmem:[#allocation2 + $0x294] ss:$8 sps:$4 sm:$0xff]  }
 0x419   :  { %2065 = vmatpush2.bf16.msra.mxu0 %v3010_v16 }
 0x41a   :  { %2066 = vmatprep.subr.bf16.mxu0 %v3015_v15 }
 0x41b   :  { %1786 = vmatmul.mubr.f32.gmra.mxu1 %v4179_v25  ;;  %v3022_v25 = vld [vmem:[#allocation2 + $0x290] ss:$8 sps:$4 sm:$0xff]  }
 0x41c   :  { %2805 = vmatprep.mubr.msk.f32.mxu1 %vm348_vm0, %v4186_v39  ;;  %v3027_v39 = vld [vmem:[#allocation2 + $0x284] ss:$8 sps:$4 sm:$0xff]  }
 0x41d   :  { %2067 = vmatpush2.bf16.msra.mxu0 %v3013_v34 }
 0x41e   :  { %2068 = vmatprep.subr.bf16.mxu0 %v3018_v0 }
 0x41f   :  { %1792 = vmatmul.mubr.f32.gmra.mxu1 %v4210_v1  ;;  %v3025_v1 = vld [vmem:[#allocation2 + $0x280] ss:$8 sps:$4 sm:$0xff]  }
 0x420   :  { %2806 = vmatprep.mubr.msk.f32.mxu1 %vm348_vm0, %v4219_v6  ;;  %v3028_v6 = vld [vmem:[#allocation2 + $0x370] ss:$8 sps:$4 sm:$0xff]  }
 0x421   :  { %2069 = vmatpush2.bf16.msra.mxu0 %v3016_v40  ;;  %2380 = vmatpush1.bf16.msra.mxu1 %v3028_v6 }
 0x422   :  { %2070 = vmatprep.subr.bf16.mxu0 %v3021_v28  ;;  %2381 = vmatprep.subr.bf16.mxu1 %v3033_v20 }
 0x423   :  { %1798 = vmatmul.mubr.f32.gmra.mxu1 %v4243_v12  ;;  %v3031_v12 = vld [vmem:[#allocation2 + $0x360] ss:$8 sps:$4 sm:$0xff]  }
 0x424   :  { %2807 = vmatprep.mubr.msk.f32.mxu1 %vm348_vm0, %v4252_v21  ;;  %v3039_v21 = vld [vmem:[#allocation2 + $0x344] ss:$8 sps:$4 sm:$0xff]  }
 0x425   :  { %2071 = vmatpush2.bf16.msra.mxu0 %v3019_v19  ;;  %2382 = vmatpush1.bf16.msra.mxu1 %v3031_v12 }
 0x426   :  { %2072 = vmatprep.subr.bf16.mxu0 %v3024_v59  ;;  %2383 = vmatprep.subr.bf16.mxu1 %v3036_v32 }
 0x427   :  { %1804 = vmatmul.mubr.f32.gmra.mxu1 %v4272_v31  ;;  %v3048_v31 = vld [vmem:[#allocation2 + $0x314] ss:$8 sps:$4 sm:$0xff]  }
 0x428   :  { %2808 = vmatprep.mubr.msk.f32.mxu1 %vm348_vm0, %v4280_v58  ;;  %v3051_v58 = vld [vmem:[#allocation2 + $0x304] ss:$8 sps:$4 sm:$0xff]  }
 0x429   :  { %2073 = vmatpush2.bf16.msra.mxu0 %v3022_v25  ;;  %2384 = vmatpush1.bf16.msra.mxu1 %v3034_v35 }
 0x42a   :  { %2074 = vmatprep.subr.bf16.mxu0 %v3027_v39  ;;  %2385 = vmatprep.subr.bf16.mxu1 %v3039_v21 }
 0x42b   :  { %1810 = vmatmul.mubr.f32.gmra.mxu1 %v4301_v63  ;;  %v3058_v63 = vld [vmem:[#allocation2 + $0x3d0] ss:$8 sps:$4 sm:$0xff]  }
 0x42c   :  { %2809 = vmatprep.mubr.msk.f32.mxu1 %vm348_vm0, %v4312_v44  ;;  %v3066_v44 = vld [vmem:[#allocation2 + $0x3b4] ss:$8 sps:$4 sm:$0xff]  }
 0x42d   :  { %2075 = vmatpush2.bf16.msra.mxu0 %v3025_v1  ;;  %2386 = vmatpush1.bf16.msra.mxu1 %v3037_v23 }
 0x42e   :  { %2387 = vmatprep.subr.bf16.mxu1 %v3042_v24 }
 0x42f   :  { %1816 = vmatmul.mubr.f32.gmra.mxu1 %v4330_v54 }
 0x431   :  { %2388 = vmatpush1.bf16.msra.mxu1 %v3040_v29 }
 0x432   :  { %2389 = vmatprep.subr.bf16.mxu1 %v3045_v3 }
 0x435   :  { %2390 = vmatpush1.bf16.msra.mxu1 %v3043_v8 }
 0x436   :  { %2391 = vmatprep.subr.bf16.mxu1 %v3048_v31  ;;  %v3069_v31 = vld [vmem:[#allocation2 + $0x3a4] ss:$8 sps:$4 sm:$0xff]  }
 0x439   :  { %2392 = vmatpush1.bf16.msra.mxu1 %v3046_v52  ;;  %v3067_v52 = vld [vmem:[#allocation2 + $0x3a0] ss:$8 sps:$4 sm:$0xff]  }
 0x43a   :  { %2393 = vmatprep.subr.bf16.mxu1 %v3051_v58  ;;  %v3072_v58 = vld [vmem:[#allocation2 + $0x394] ss:$8 sps:$4 sm:$0xff]  }
 0x43d   :  { %2394 = vmatpush1.bf16.msra.mxu1 %v3049_v37  ;;  %v3070_v37 = vld [vmem:[#allocation2 + $0x390] ss:$8 sps:$4 sm:$0xff]  }
 0x43e   :  { %2395 = vmatprep.subr.bf16.mxu1 %v3054_v60  ;;  %v3075_v60 = vld [vmem:[#allocation2 + $0x384] ss:$8 sps:$4 sm:$0xff]  }
 0x441   :  { %2396 = vmatpush2.bf16.msra.mxu1 %v3052_v38  ;;  %v3073_v38 = vld [vmem:[#allocation2 + $0x380] ss:$8 sps:$4 sm:$0xff]  }
 0x442   :  { %2397 = vmatprep.subr.bf16.mxu1 %v3057_v61 }
 0x445   :  { %2398 = vmatpush2.bf16.msra.mxu1 %v3055_v42  ;;  %v2810_v42 = vld [vmem:[%s4564_s3 + $0x4] sm:$0x3] }
 0x446   :  { %2399 = vmatprep.subr.bf16.mxu1 %v3060_v43 }
 0x449   :  { %2400 = vmatpush2.bf16.msra.mxu1 %v3058_v63  ;;  %v4387_v63 = vrot.slane %v2810_v42, %v3758_v53 }
 0x44a   :  { %2401 = vmatprep.subr.bf16.mxu1 %v3063_v7  ;;  %v4390_v7 = vrot.slane %v2810_v42, %v3761_v55 }
 0x44d   :  { %2402 = vmatpush2.bf16.msra.mxu1 %v3061_v45 }
 0x44e   :  { %2403 = vmatprep.subr.bf16.mxu1 %v3066_v44 }
 0x451   :  { %2404 = vmatpush2.bf16.msra.mxu1 %v3064_v46 }
 0x452   :  { %2405 = vmatprep.subr.bf16.mxu1 %v3069_v31 }
 0x455   :  { %2406 = vmatpush2.bf16.msra.mxu1 %v3067_v52 }
 0x456   :  { %2407 = vmatprep.subr.bf16.mxu1 %v3072_v58 }
 0x459   :  { %2408 = vmatpush2.bf16.msra.mxu1 %v3070_v37 }
 0x45a   :  { %2409 = vmatprep.subr.bf16.mxu1 %v3075_v60 }
 0x45d   :  { %2410 = vmatpush2.bf16.msra.mxu1 %v3073_v38 }
 0x4af   :  { %v1662_v41 = vpop.f32.mrf.mxu0 }
 0x4b1   :  { %v1664_v51 = vpop.f32.mrf.mxu0 }
 0x4b3   :  { %v1668_v27 = vpop.f32.mrf.mxu0 }
 0x4b4   :  { %v1822_v54 = vpack.c.bf16 %v1668_v27, %v1662_v41 }
 0x4b5   :  { %v1670_v26 = vpop.f32.mrf.mxu0 }
 0x4b6   :  { %v1823_v36 = vpack.c.bf16 %v1670_v26, %v1664_v51 }
 0x4b7   :  { %v1674_v18 = vpop.f32.mrf.mxu0 }
 0x4b8   :  { %2076 = vmatprep.mubr.bf16.mxu0 %v1823_v36 }
 0x4b9   :  { %v1676_v62 = vpop.f32.mrf.mxu0  ;;  %2077 = vmatmul.mubr.bf16.vlgmr.msra.gmra.mxu0 %v1822_v54 }
 0x4bb   :  { %v1680_v5 = vpop.f32.mrf.mxu0 }
 0x4bc   :  { %v1824_v17 = vpack.c.bf16 %v1680_v5, %v1674_v18 }
 0x4bd   :  { %v1682_v9 = vpop.f32.mrf.mxu0 }
 0x4be   :  { %v1825_v14 = vpack.c.bf16 %v1682_v9, %v1676_v62 }
 0x4bf   :  { %v1686_v22 = vpop.f32.mrf.mxu0 }
 0x4c0   :  { %2086 = vmatprep.mubr.bf16.mxu0 %v1825_v14 }
 0x4c1   :  { %v1688_v30 = vpop.f32.mrf.mxu0  ;;  %2087 = vmatmul.mubr.bf16.gmra.mxu0 %v1824_v17 }
 0x4c3   :  { %v1692_v33 = vpop.f32.mrf.mxu0 }
 0x4c4   :  { %v1826_v49 = vpack.c.bf16 %v1692_v33, %v1686_v22 }
 0x4c5   :  { %v1694_v47 = vpop.f32.mrf.mxu0 }
 0x4c6   :  { %v1827_v48 = vpack.c.bf16 %v1694_v47, %v1688_v30 }
 0x4c7   :  { %v1698_v50 = vpop.f32.mrf.mxu0 }
 0x4c8   :  { %2096 = vmatprep.mubr.bf16.mxu0 %v1827_v48 }
 0x4c9   :  { %v1700_v56 = vpop.f32.mrf.mxu0  ;;  %2097 = vmatmul.mubr.bf16.gmra.mxu0 %v1826_v49 }
 0x4cb   :  { %v1704_v57 = vpop.f32.mrf.mxu0 }
 0x4cc   :  { %v1828_v10 = vpack.c.bf16 %v1704_v57, %v1698_v50 }
 0x4cd   :  { %v1706_v2 = vpop.f32.mrf.mxu0 }
 0x4ce   :  { %v1829_v4 = vpack.c.bf16 %v1706_v2, %v1700_v56 }
 0x4d0   :  { %2106 = vmatprep.mubr.bf16.mxu0 %v1829_v4 }
 0x4d1   :  { %2107 = vmatmul.mubr.bf16.gmra.mxu0 %v1828_v10 }
 0x4d3   :  { %v1775_v11 = vpop.f32.mrf.mxu1 }
 0x4d5   :  { %v1777_v16 = vpop.f32.mrf.mxu1 }
 0x4d7   :  { %v1781_v15 = vpop.f32.mrf.mxu1 }
 0x4d8   :  { %v1830_v40 = vpack.c.bf16 %v1781_v15, %v1775_v11 }
 0x4d9   :  { %v1783_v34 = vpop.f32.mrf.mxu1 }
 0x4da   :  { %v1831_v0 = vpack.c.bf16 %v1783_v34, %v1777_v16 }
 0x4db   :  { %v1787_v28 = vpop.f32.mrf.mxu1 }
 0x4dc   :  { %2116 = vmatprep.mubr.bf16.mxu0 %v1831_v0 }
 0x4dd   :  { %v1789_v19 = vpop.f32.mrf.mxu1  ;;  %2117 = vmatmul.mubr.bf16.gmra.mxu0 %v1830_v40 }
 0x4df   :  { %v1793_v59 = vpop.f32.mrf.mxu1 }
 0x4e0   :  { %v1832_v1 = vpack.c.bf16 %v1793_v59, %v1787_v28 }
 0x4e1   :  { %v1795_v25 = vpop.f32.mrf.mxu1 }
 0x4e2   :  { %v1833_v39 = vpack.c.bf16 %v1795_v25, %v1789_v19 }
 0x4e3   :  { %v1799_v6 = vpop.f32.mrf.mxu1 }
 0x4e4   :  { %2126 = vmatprep.mubr.bf16.mxu0 %v1833_v39 }
 0x4e5   :  { %v1801_v13 = vpop.f32.mrf.mxu1  ;;  %2127 = vmatmul.mubr.bf16.gmra.mxu0 %v1832_v1 }
 0x4e7   :  { %v1805_v20 = vpop.f32.mrf.mxu1 }
 0x4e8   :  { %v1834_v35 = vpack.c.bf16 %v1805_v20, %v1799_v6 }
 0x4e9   :  { %v1807_v12 = vpop.f32.mrf.mxu1 }
 0x4ea   :  { %v1835_v32 = vpack.c.bf16 %v1807_v12, %v1801_v13 }
 0x4eb   :  { %v1811_v21 = vpop.f32.mrf.mxu1 }
 0x4ec   :  { %2136 = vmatprep.mubr.bf16.mxu0 %v1835_v32 }
 0x4ed   :  { %v1813_v23 = vpop.f32.mrf.mxu1  ;;  %2137 = vmatmul.mubr.bf16.gmra.mxu0 %v1834_v35 }
 0x4ef   :  { %v1817_v24 = vpop.f32.mrf.mxu1 }
 0x4f0   :  { %v1836_v8 = vpack.c.bf16 %v1817_v24, %v1811_v21 }
 0x4f1   :  { %v1819_v29 = vpop.f32.mrf.mxu1 }
 0x4f2   :  { %v1837_v3 = vpack.c.bf16 %v1819_v29, %v1813_v23 }
 0x4f4   :  { %2146 = vmatprep.mubr.bf16.mxu0 %v1837_v3 }
 0x4f5   :  { %2147 = vmatmul.mubr.bf16.gmra.mxu0 %v1836_v8 }
 0x579   :  { %v2078_v61 = vpop.f32.mrf.mxu0 }
 0x57a   :  { %v2079_v27 = vadd.f32 %v2078_v61, %v4390_v7 }
 0x57b   :  { %v2080_v43 = vpop.f32.mrf.mxu0 }
 0x57c   :  { %v2081_v41 = vadd.f32 %v2080_v43, %v4387_v63 }
 0x57d   :  { %v2082_v45 = vpop.f32.mrf.mxu0 }
 0x57e   :  { %v2083_v44 = vadd.f32 %v2082_v45, %v4390_v7 }
 0x57f   :  { %v2084_v46 = vpop.f32.mrf.mxu0 }
 0x580   :  { %v2085_v51 = vadd.f32 %v2084_v46, %v4387_v63  ;;  %v2157_v54 = vpack.c.bf16 %v2083_v44, %v2079_v27 }
 0x581   :  { %v2088_v26 = vpop.f32.mrf.mxu0 }
 0x582   :  { %v2158_v36 = vpack.c.bf16 %v2085_v51, %v2081_v41  ;;  %v2089_v22 = vadd.f32 %v2088_v26, %v4390_v7 }
 0x583   :  { %v2090_v18 = vpop.f32.mrf.mxu0 }
 0x584   :  { %2411 = vmatprep.mubr.bf16.mxu1 %v2158_v36  ;;  %v2091_v14 = vadd.f32 %v2090_v18, %v4387_v63 }
 0x585   :  { %v2092_v62 = vpop.f32.mrf.mxu0  ;;  %2412 = vmatmul.mubr.bf16.vlgmr.msra.gmra.mxu1 %v2157_v54 }
 0x586   :  { %v2093_v5 = vadd.f32 %v2092_v62, %v4390_v7 }
 0x587   :  { %v2094_v9 = vpop.f32.mrf.mxu0 }
 0x588   :  { %v2095_v17 = vadd.f32 %v2094_v9, %v4387_v63  ;;  %v2159_v47 = vpack.c.bf16 %v2093_v5, %v2089_v22 }
 0x589   :  { %v2098_v30 = vpop.f32.mrf.mxu0 }
 0x58a   :  { %v2160_v33 = vpack.c.bf16 %v2095_v17, %v2091_v14  ;;  %v2099_v4 = vadd.f32 %v2098_v30, %v4390_v7 }
 0x58b   :  { %v2100_v48 = vpop.f32.mrf.mxu0 }
 0x58c   :  { %2421 = vmatprep.mubr.bf16.mxu1 %v2160_v33  ;;  %v2101_v57 = vadd.f32 %v2100_v48, %v4387_v63 }
 0x58d   :  { %v2102_v49 = vpop.f32.mrf.mxu0  ;;  %2422 = vmatmul.mubr.bf16.gmra.mxu1 %v2159_v47  ;;  %v2843_v47 = vld [vmem:[%s4564_s3 + $0x6] sm:$0x3] }
 0x58e   :  { %v2103_v50 = vadd.f32 %v2102_v49, %v4390_v7  ;;  %v4428_v48 = vrot.slane %v2843_v47, %v3761_v55  ;;  %v4431_v49 = vrot.slane %v2843_v47, %v3758_v53 }
 0x58f   :  { %v2104_v56 = vpop.f32.mrf.mxu0 }
 0x590   :  { %v2105_v2 = vadd.f32 %v2104_v56, %v4387_v63  ;;  %v2161_v16 = vpack.c.bf16 %v2103_v50, %v2099_v4 }
 0x591   :  { %v2108_v10 = vpop.f32.mrf.mxu0 }
 0x592   :  { %v2162_v11 = vpack.c.bf16 %v2105_v2, %v2101_v57  ;;  %v2109_v59 = vadd.f32 %v2108_v10, %v4390_v7 }
 0x593   :  { %v2110_v15 = vpop.f32.mrf.mxu0 }
 0x594   :  { %2431 = vmatprep.mubr.bf16.mxu1 %v2162_v11  ;;  %v2111_v28 = vadd.f32 %v2110_v15, %v4387_v63 }
 0x595   :  { %v2112_v34 = vpop.f32.mrf.mxu0  ;;  %2432 = vmatmul.mubr.bf16.gmra.mxu1 %v2161_v16 }
 0x596   :  { %v2113_v0 = vadd.f32 %v2112_v34, %v4390_v7 }
 0x597   :  { %v2114_v40 = vpop.f32.mrf.mxu0 }
 0x598   :  { %v2115_v19 = vadd.f32 %v2114_v40, %v4387_v63  ;;  %v2163_v39 = vpack.c.bf16 %v2113_v0, %v2109_v59 }
 0x59a   :  { %v2164_v25 = vpack.c.bf16 %v2115_v19, %v2111_v28 }
 0x59c   :  { %2441 = vmatprep.mubr.bf16.mxu1 %v2164_v25 }
 0x59d   :  { %v2118_v1 = vpop.f32.mrf.mxu0  ;;  %2442 = vmatmul.mubr.bf16.gmra.mxu1 %v2163_v39 }
 0x59e   :  { %v2119_v21 = vadd.f32 %v2118_v1, %v4390_v7 }
 0x59f   :  { %v2120_v6 = vpop.f32.mrf.mxu0 }
 0x5a0   :  { %v2121_v32 = vadd.f32 %v2120_v6, %v4387_v63 }
 0x5a1   :  { %v2122_v13 = vpop.f32.mrf.mxu0 }
 0x5a2   :  { %v2123_v20 = vadd.f32 %v2122_v13, %v4390_v7 }
 0x5a3   :  { %v2124_v12 = vpop.f32.mrf.mxu0 }
 0x5a4   :  { %v2125_v35 = vadd.f32 %v2124_v12, %v4387_v63  ;;  %v2165_v29 = vpack.c.bf16 %v2123_v20, %v2119_v21 }
 0x5a5   :  { %v2128_v23 = vpop.f32.mrf.mxu0 }
 0x5a6   :  { %v2166_v24 = vpack.c.bf16 %v2125_v35, %v2121_v32  ;;  %v2129_v60 = vadd.f32 %v2128_v23, %v4390_v7 }
 0x5a7   :  { %v2130_v3 = vpop.f32.mrf.mxu0 }
 0x5a8   :  { %2451 = vmatprep.mubr.bf16.mxu1 %v2166_v24  ;;  %v2131_v58 = vadd.f32 %v2130_v3, %v4387_v63 }
 0x5a9   :  { %v2132_v8 = vpop.f32.mrf.mxu0  ;;  %2452 = vmatmul.mubr.bf16.gmra.mxu1 %v2165_v29 }
 0x5aa   :  { %v2133_v31 = vadd.f32 %v2132_v8, %v4390_v7 }
 0x5ab   :  { %v2134_v52 = vpop.f32.mrf.mxu0 }
 0x5ac   :  { %v2135_v37 = vadd.f32 %v2134_v52, %v4387_v63  ;;  %v2167_v42 = vpack.c.bf16 %v2133_v31, %v2129_v60 }
 0x5ad   :  { %v2138_v38 = vpop.f32.mrf.mxu0 }
 0x5ae   :  { %v2168_v61 = vpack.c.bf16 %v2135_v37, %v2131_v58  ;;  %v2139_v27 = vadd.f32 %v2138_v38, %v4390_v7 }
 0x5af   :  { %v2140_v43 = vpop.f32.mrf.mxu0 }
 0x5b0   :  { %2461 = vmatprep.mubr.bf16.mxu1 %v2168_v61  ;;  %v2141_v41 = vadd.f32 %v2140_v43, %v4387_v63 }
 0x5b1   :  { %v2142_v45 = vpop.f32.mrf.mxu0  ;;  %2462 = vmatmul.mubr.bf16.gmra.mxu1 %v2167_v42 }
 0x5b2   :  { %v2143_v44 = vadd.f32 %v2142_v45, %v4390_v7 }
 0x5b3   :  { %v2144_v46 = vpop.f32.mrf.mxu0 }
 0x5b4   :  { %v2145_v51 = vadd.f32 %v2144_v46, %v4387_v63  ;;  %v2169_v54 = vpack.c.bf16 %v2143_v44, %v2139_v27 }
 0x5b5   :  { %v2148_v26 = vpop.f32.mrf.mxu0 }
 0x5b6   :  { %v2170_v36 = vpack.c.bf16 %v2145_v51, %v2141_v41  ;;  %v2149_v22 = vadd.f32 %v2148_v26, %v4390_v7 }
 0x5b7   :  { %v2150_v18 = vpop.f32.mrf.mxu0 }
 0x5b8   :  { %2471 = vmatprep.mubr.bf16.mxu1 %v2170_v36  ;;  %v2151_v14 = vadd.f32 %v2150_v18, %v4387_v63 }
 0x5b9   :  { %v2152_v62 = vpop.f32.mrf.mxu0  ;;  %2472 = vmatmul.mubr.bf16.gmra.mxu1 %v2169_v54 }
 0x5ba   :  { %v2153_v5 = vadd.f32 %v2152_v62, %v4390_v7 }
 0x5bb   :  { %v2154_v9 = vpop.f32.mrf.mxu0 }
 0x5bc   :  { %v2155_v17 = vadd.f32 %v2154_v9, %v4387_v63  ;;  %v2171_v33 = vpack.c.bf16 %v2153_v5, %v2149_v22 }
 0x5be   :  { %v2172_v30 = vpack.c.bf16 %v2155_v17, %v2151_v14 }
 0x5c0   :  { %2481 = vmatprep.mubr.bf16.mxu1 %v2172_v30 }
 0x5c1   :  { %2482 = vmatmul.mubr.bf16.gmra.mxu1 %v2171_v33 }
 0x645   :  { %v2413_v50 = vpop.f32.mrf.mxu1 }
 0x646   :  { %v2414_v56 = vadd.f32 %v2413_v50, %v4428_v48 }
 0x647   :  { %v2415_v63 = vpop.f32.mrf.mxu1 }
 0x648   :  { %v2492_v57 = vmax.f32 %v2414_v56, 0.0  ;;  %v2416_v7 = vadd.f32 %v2415_v63, %v4431_v49 }
 0x649   :  { %v2417_v2 = vpop.f32.mrf.mxu1 }
 0x64a   :  { %2524 = vst [vmem:[%s4565_s4] sm:$0xff] %v2492_v57  ;;  %v2493_v4 = vmax.f32 %v2416_v7, 0.0  ;;  %v2418_v10 = vadd.f32 %v2417_v2, %v4428_v48 }
 0x64b   :  { %v2419_v55 = vpop.f32.mrf.mxu1 }
 0x64c   :  { %2525 = vst [vmem:[%s4565_s4 + $0x8] sm:$0xff] %v2493_v4  ;;  %v2494_v53 = vmax.f32 %v2418_v10, 0.0  ;;  %v2420_v11 = vadd.f32 %v2419_v55, %v4431_v49 }
 0x64d   :  { %v2423_v16 = vpop.f32.mrf.mxu1 }
 0x64e   :  { %2526 = vst [vmem:[%s4565_s4 + $0x10] sm:$0xff] %v2494_v53  ;;  %v2495_v15 = vmax.f32 %v2420_v11, 0.0  ;;  %v2424_v34 = vadd.f32 %v2423_v16, %v4428_v48 }
 0x64f   :  { %v2425_v0 = vpop.f32.mrf.mxu1 }
 0x650   :  { %2527 = vst [vmem:[%s4565_s4 + $0x18] sm:$0xff] %v2495_v15  ;;  %v2496_v40 = vmax.f32 %v2424_v34, 0.0  ;;  %v2426_v28 = vadd.f32 %v2425_v0, %v4431_v49 }
 0x651   :  { %v2427_v19 = vpop.f32.mrf.mxu1 }
 0x652   :  { %2528 = vst [vmem:[%s4565_s4 + $0x20] sm:$0xff] %v2496_v40  ;;  %v2497_v59 = vmax.f32 %v2426_v28, 0.0  ;;  %v2428_v25 = vadd.f32 %v2427_v19, %v4428_v48 }
 0x653   :  { %v2429_v39 = vpop.f32.mrf.mxu1 }
 0x654   :  { %2529 = vst [vmem:[%s4565_s4 + $0x28] sm:$0xff] %v2497_v59  ;;  %v2498_v1 = vmax.f32 %v2428_v25, 0.0  ;;  %v2430_v6 = vadd.f32 %v2429_v39, %v4431_v49 }
 0x655   :  { %v2433_v13 = vpop.f32.mrf.mxu1 }
 0x656   :  { %2530 = vst [vmem:[%s4565_s4 + $0x30] sm:$0xff] %v2498_v1  ;;  %v2499_v20 = vmax.f32 %v2430_v6, 0.0  ;;  %v2434_v12 = vadd.f32 %v2433_v13, %v4428_v48 }
 0x657   :  { %v2435_v32 = vpop.f32.mrf.mxu1 }
 0x658   :  { %2531 = vst [vmem:[%s4565_s4 + $0x38] sm:$0xff] %v2499_v20  ;;  %v2500_v35 = vmax.f32 %v2434_v12, 0.0  ;;  %v2436_v21 = vadd.f32 %v2435_v32, %v4431_v49 }
 0x659   :  { %v2437_v23 = vpop.f32.mrf.mxu1 }
 0x65a   :  { %2532 = vst [vmem:[%s4565_s4 + $0x40] sm:$0xff] %v2500_v35  ;;  %v2501_v24 = vmax.f32 %v2436_v21, 0.0  ;;  %v2438_v29 = vadd.f32 %v2437_v23, %v4428_v48 }
 0x65b   :  { %v2439_v3 = vpop.f32.mrf.mxu1 }
 0x65c   :  { %2533 = vst [vmem:[%s4565_s4 + $0x48] sm:$0xff] %v2501_v24  ;;  %v2502_v8 = vmax.f32 %v2438_v29, 0.0  ;;  %v2440_v31 = vadd.f32 %v2439_v3, %v4431_v49 }
 0x65d   :  { %v2443_v52 = vpop.f32.mrf.mxu1 }
 0x65e   :  { %2534 = vst [vmem:[%s4565_s4 + $0x50] sm:$0xff] %v2502_v8  ;;  %v2503_v58 = vmax.f32 %v2440_v31, 0.0  ;;  %v2444_v37 = vadd.f32 %v2443_v52, %v4428_v48 }
 0x65f   :  { %v2445_v60 = vpop.f32.mrf.mxu1 }
 0x660   :  { %2535 = vst [vmem:[%s4565_s4 + $0x58] sm:$0xff] %v2503_v58  ;;  %v2504_v38 = vmax.f32 %v2444_v37, 0.0  ;;  %v2446_v61 = vadd.f32 %v2445_v60, %v4431_v49 }
 0x661   :  { %v2447_v42 = vpop.f32.mrf.mxu1 }
 0x662   :  { %2536 = vst [vmem:[%s4565_s4 + $0x60] sm:$0xff] %v2504_v38  ;;  %v2505_v43 = vmax.f32 %v2446_v61, 0.0  ;;  %v2448_v45 = vadd.f32 %v2447_v42, %v4428_v48 }
 0x663   :  { %v2449_v44 = vpop.f32.mrf.mxu1 }
 0x664   :  { %2537 = vst [vmem:[%s4565_s4 + $0x68] sm:$0xff] %v2505_v43  ;;  %v2506_v46 = vmax.f32 %v2448_v45, 0.0  ;;  %v2450_v41 = vadd.f32 %v2449_v44, %v4431_v49 }
 0x666   :  { %2538 = vst [vmem:[%s4565_s4 + $0x70] sm:$0xff] %v2506_v46  ;;  %v2507_v51 = vmax.f32 %v2450_v41, 0.0 }
 0x668   :  { %2539 = vst [vmem:[%s4565_s4 + $0x78] sm:$0xff] %v2507_v51 }
 0x669   :  { %v2453_v27 = vpop.f32.mrf.mxu1 }
 0x66a   :  { %v2454_v26 = vadd.f32 %v2453_v27, %v4428_v48 }
 0x66b   :  { %v2455_v36 = vpop.f32.mrf.mxu1 }
 0x66c   :  { %v2508_v54 = vmax.f32 %v2454_v26, 0.0  ;;  %v2456_v18 = vadd.f32 %v2455_v36, %v4431_v49 }
 0x66d   :  { %v2457_v62 = vpop.f32.mrf.mxu1 }
 0x66e   :  { %2540 = vst [vmem:[%s4565_s4 + $0x80] sm:$0xff] %v2508_v54  ;;  %v2509_v5 = vmax.f32 %v2456_v18, 0.0  ;;  %v2458_v9 = vadd.f32 %v2457_v62, %v4428_v48 }
 0x66f   :  { %v2459_v14 = vpop.f32.mrf.mxu1 }
 0x670   :  { %2541 = vst [vmem:[%s4565_s4 + $0x88] sm:$0xff] %v2509_v5  ;;  %v2510_v17 = vmax.f32 %v2458_v9, 0.0  ;;  %v2460_v22 = vadd.f32 %v2459_v14, %v4431_v49 }
 0x671   :  { %v2463_v30 = vpop.f32.mrf.mxu1 }
 0x672   :  { %2542 = vst [vmem:[%s4565_s4 + $0x90] sm:$0xff] %v2510_v17  ;;  %v2511_v33 = vmax.f32 %v2460_v22, 0.0  ;;  %v2464_v47 = vadd.f32 %v2463_v30, %v4428_v48 }
 0x673   :  { %v2465_v50 = vpop.f32.mrf.mxu1 }
 0x674   :  { %2543 = vst [vmem:[%s4565_s4 + $0x98] sm:$0xff] %v2511_v33  ;;  %v2512_v56 = vmax.f32 %v2464_v47, 0.0  ;;  %v2466_v63 = vadd.f32 %v2465_v50, %v4431_v49 }
 0x675   :  { %v2467_v57 = vpop.f32.mrf.mxu1 }
 0x676   :  { %2544 = vst [vmem:[%s4565_s4 + $0xa0] sm:$0xff] %v2512_v56  ;;  %v2513_v7 = vmax.f32 %v2466_v63, 0.0  ;;  %v2468_v2 = vadd.f32 %v2467_v57, %v4428_v48 }
 0x677   :  { %v2469_v4 = vpop.f32.mrf.mxu1 }
 0x678   :  { %2545 = vst [vmem:[%s4565_s4 + $0xa8] sm:$0xff] %v2513_v7  ;;  %v2514_v10 = vmax.f32 %v2468_v2, 0.0  ;;  %v2470_v55 = vadd.f32 %v2469_v4, %v4431_v49 }
 0x679   :  { %v2473_v53 = vpop.f32.mrf.mxu1 }
 0x67a   :  { %2546 = vst [vmem:[%s4565_s4 + $0xb0] sm:$0xff] %v2514_v10  ;;  %v2515_v11 = vmax.f32 %v2470_v55, 0.0  ;;  %v2474_v16 = vadd.f32 %v2473_v53, %v4428_v48 }
 0x67b   :  { %v2475_v15 = vpop.f32.mrf.mxu1 }
 0x67c   :  { %2547 = vst [vmem:[%s4565_s4 + $0xb8] sm:$0xff] %v2515_v11  ;;  %v2516_v34 = vmax.f32 %v2474_v16, 0.0  ;;  %v2476_v0 = vadd.f32 %v2475_v15, %v4431_v49 }
 0x67d   :  { %v2477_v40 = vpop.f32.mrf.mxu1 }
 0x67e   :  { %2548 = vst [vmem:[%s4565_s4 + $0xc0] sm:$0xff] %v2516_v34  ;;  %v2517_v28 = vmax.f32 %v2476_v0, 0.0  ;;  %v2478_v19 = vadd.f32 %v2477_v40, %v4428_v48 }
 0x67f   :  { %v2479_v59 = vpop.f32.mrf.mxu1 }
 0x680   :  { %2549 = vst [vmem:[%s4565_s4 + $0xc8] sm:$0xff] %v2517_v28  ;;  %v2518_v25 = vmax.f32 %v2478_v19, 0.0  ;;  %v2480_v39 = vadd.f32 %v2479_v59, %v4431_v49 }
 0x681   :  { %v2483_v1 = vpop.f32.mrf.mxu1 }
 0x682   :  { %2550 = vst [vmem:[%s4565_s4 + $0xd0] sm:$0xff] %v2518_v25  ;;  %v2519_v6 = vmax.f32 %v2480_v39, 0.0  ;;  %v2484_v13 = vadd.f32 %v2483_v1, %v4428_v48 }
 0x683   :  { %v2485_v20 = vpop.f32.mrf.mxu1 }
 0x684   :  { %2551 = vst [vmem:[%s4565_s4 + $0xd8] sm:$0xff] %v2519_v6  ;;  %v2520_v12 = vmax.f32 %v2484_v13, 0.0  ;;  %v2486_v32 = vadd.f32 %v2485_v20, %v4431_v49 }
 0x685   :  { %v2487_v35 = vpop.f32.mrf.mxu1 }
 0x686   :  { %2552 = vst [vmem:[%s4565_s4 + $0xe0] sm:$0xff] %v2520_v12  ;;  %v2521_v21 = vmax.f32 %v2486_v32, 0.0  ;;  %v2488_v23 = vadd.f32 %v2487_v35, %v4428_v48 }
 0x687   :  { %v2489_v24 = vpop.f32.mrf.mxu1 }
 0x688   :  { %2553 = vst [vmem:[%s4565_s4 + $0xe8] sm:$0xff] %v2521_v21  ;;  %v2522_v29 = vmax.f32 %v2488_v23, 0.0  ;;  %v2490_v3 = vadd.f32 %v2489_v24, %v4431_v49 }
 0x68a   :  { %2554 = vst [vmem:[%s4565_s4 + $0xf0] sm:$0xff] %v2522_v29  ;;  %v2523_v8 = vmax.f32 %v2490_v3, 0.0 }
 0x68c   :  { %2555 = vst [vmem:[%s4565_s4 + $0xf8] sm:$0xff] %v2523_v8 }
 0x68d   :  { %2560 = vsyncpa [#allocation3], 1 }

</bundles_post_ra>
